<compile_context>
chip_gen: v5e
topology: v5e:2x2
jax: 0.10.0
libtpu: 0.0.40
codegen_flags: <defaults>
</compile_context>

<pallas_src>
import math
import numpy as np
import jax
import jax.numpy as jnp
from jax.experimental import pallas as pl
from jax.experimental.pallas import tpu as pltpu


def _round_up(x, m):
    return (x + m - 1) // m * m


def _make_rdb_kernel(L, H, W, C, G, Qpad, Pbuf):
    Wp = W + 2                    # padded row width
    P = (H + 2) * Wp              # flattened padded-image length
    Q = H * Wp                    # valid output-frame length (q = h*Wp + w)
    C_total = C + L * G
    n_params = 2 * L + 2

    def kernel(x_ref, mask_ref, *rest):
        param_refs = rest[:n_params]
        out_ref = rest[n_params]
        buf_ref = rest[n_params + 1]          # (C_total, Pbuf) bf16 scratch

        # Valid-output mask (1, Qpad): 1.0 iff w < W and h < H for q = h*Wp+w.
        valid = mask_ref[...] > 0.5

        # x arrives spatially zero-padded, flattened and lane-padded to Pbuf.
        buf_ref[0:C, :] = x_ref[0].astype(jnp.bfloat16)

        # Keep the zero border of the grown-feature channels valid EVERY grid
        # step: scratch is per-core under "parallel" semantics, so a one-time
        # program_id==0 init is not safe.  The border is tiny (vs. zero-filling
        # whole (H+2,W+2,*) buffers every layer in the previous version).
        buf_ref[C:C_total, 0:W + 3] = jnp.zeros((L * G, W + 3), jnp.bfloat16)
        tail = W + 3 + Qpad
        if tail < Pbuf:
            buf_ref[C:C_total, tail:Pbuf] = jnp.zeros(
                (L * G, Pbuf - tail), jnp.bfloat16)

        # Dense layers: 3x3 same-conv over the virtual channel concat + ReLU,
        # result written back into the next channel slice of the buffer.
        for i in range(L):
            K = C + i * G
            w_ref = param_refs[2 * i]          # (9, G, K)  bf16
            b_ref = param_refs[2 * i + 1]      # (G, 1)     f32
            acc = jnp.broadcast_to(b_ref[...], (G, Qpad))   # bias folded in
            for dh in range(3):
                for dw in range(3):
                    off = dh * Wp + dw
                    win = buf_ref[0:K, off:off + Qpad]      # (K, Qpad) bf16
                    acc = acc + jnp.dot(w_ref[3 * dh + dw], win,
                                        preferred_element_type=jnp.float32)
            # Zero the padding/garbage columns so they stay valid zero-padding
            # for the next layer's taps (where(), not *, to kill any NaN junk).
            o = jnp.where(valid, jnp.maximum(acc, 0.0), 0.0)
            buf_ref[C + i * G:C + (i + 1) * G, W + 3:W + 3 + Qpad] = (
                o.astype(jnp.bfloat16))

        # 1x1 conv over the full concat; bias + f32 residual folded into init.
        w1_ref = param_refs[2 * L]             # (C, C_total) bf16
        b1_ref = param_refs[2 * L + 1]         # (C, 1)       f32
        concat = buf_ref[:, W + 3:W + 3 + Qpad]              # (C_total, Qpad)
        res = x_ref[0, :, W + 3:W + 3 + Qpad].astype(jnp.float32) + b1_ref[...]
        res = res + jnp.dot(w1_ref[...], concat,
                            preferred_element_type=jnp.float32)
        out_ref[0] = res.astype(out_ref.dtype)               # lane-dense store

    return kernel


def rdb_pallas(x_nchw, dense_params, final_params):
    """RDB forward. x_nchw: (N, C, H, W) float32 -> (N, C, H, W) float32."""
    N, C, H, W = x_nchw.shape
    L = len(dense_params)
    G = dense_params[0][0].shape[-1]
    C_total = C + L * G
    Wp = W + 2
    P = (H + 2) * Wp
    Q = H * Wp
    Qpad = _round_up(Q, 128)                          # lane-aligned compute width
    Pbuf = _round_up(max(P, Qpad + 2 * Wp + 2), 128)  # scratch lane extent

    # Zero-pad spatially, flatten H/W onto the lane axis, pad lanes to Pbuf so
    # in-kernel tap windows never run off the end of the buffer.
    x_pad = jnp.pad(x_nchw.astype(jnp.float32), ((0, 0), (0, 0), (1, 1), (1, 1)))
    x_flat = jnp.pad(x_pad.reshape(N, C, P), ((0, 0), (0, 0), (0, Pbuf - P)))

    # Valid-output mask over the q = h*(W+2)+w frame (computed on host).
    q = np.arange(Qpad)
    valid_mask = jnp.asarray((((q % Wp) < W) & (q < Q))
                             .reshape(1, Qpad).astype(np.float32))

    # Weights: per-tap (G, K) bf16 matrices; 1x1 weight transposed to (C, Ct).
    flat_params = []
    for (w, b) in dense_params:
        K = w.shape[2]
        flat_params.append(jnp.transpose(w, (0, 1, 3, 2))
                           .reshape(9, G, K).astype(jnp.bfloat16))
        flat_params.append(b.reshape(G, 1).astype(jnp.float32))
    w1, b1 = final_params
    flat_params.append(jnp.transpose(w1).astype(jnp.bfloat16))   # (C, C_total)
    flat_params.append(b1.reshape(C, 1).astype(jnp.float32))

    in_specs = [pl.BlockSpec((1, C, Pbuf), lambda n: (n, 0, 0)),
                pl.BlockSpec((1, Qpad), lambda n: (0, 0))]
    for p in flat_params:
        in_specs.append(pl.BlockSpec(p.shape, lambda n, nd=p.ndim: (0,) * nd))
    out_spec = pl.BlockSpec((1, C, Qpad), lambda n: (n, 0, 0))

    flops = N * 2 * H * W * (sum(9 * (C + i * G) * G for i in range(L))
                             + C_total * C)
    bytes_accessed = int(x_flat.size) * 4 + N * C * Qpad * 4 + Qpad * 4
    bytes_accessed += sum(int(p.size) * p.dtype.itemsize for p in flat_params)

    kernel = _make_rdb_kernel(L, H, W, C, G, Qpad, Pbuf)
    out_flat = pl.pallas_call(
        kernel,
        out_shape=jax.ShapeDtypeStruct((N, C, Qpad), jnp.float32),
        grid=(N,),
        in_specs=in_specs,
        out_specs=out_spec,
        scratch_shapes=[pltpu.VMEM((C_total, Pbuf), jnp.bfloat16)],
        compiler_params=pltpu.CompilerParams(
            dimension_semantics=("parallel",),
            vmem_limit_bytes=64 * 1024 * 1024),
        cost_estimate=pl.CostEstimate(
            flops=flops, transcendentals=0, bytes_accessed=bytes_accessed),
    )(x_flat, valid_mask, *flat_params)

    # Drop padded / garbage columns and restore NCHW.
    return out_flat[:, :, :Q].reshape(N, C, H, Wp)[:, :, :, :W]


def rdb_reference(x_nchw, dense_params, final_params):
    """Pure-JAX reference matching the PyTorch RDB forward (f32, HIGHEST)."""
    x = jnp.transpose(x_nchw, (0, 2, 3, 1))
    feat = x
    for (w, b) in dense_params:
        out = jax.lax.conv_general_dilated(
            feat, w, (1, 1), [(1, 1), (1, 1)],
            dimension_numbers=('NHWC', 'HWIO', 'NHWC'),
            precision=jax.lax.Precision.HIGHEST)
        out = jnp.maximum(out + b.reshape(1, 1, 1, -1), 0.0)
        feat = jnp.concatenate([feat, out], axis=-1)
    w1, b1 = final_params
    out = jnp.einsum('nhwc,cd->nhwd', feat, w1,
                     precision=jax.lax.Precision.HIGHEST) + b1
    out = out + x
    return jnp.transpose(out, (0, 3, 1, 2))


def init_params(key, in_channels, num_dense_layer, growth_rate):
    """Deterministic synthetic init (PyTorch-Conv2d-like uniform bounds)."""
    dense = []
    cin = in_channels
    for _ in range(num_dense_layer):
        key, kw, kb = jax.random.split(key, 3)
        bound = 1.0 / math.sqrt(cin * 9)
        w = jax.random.uniform(kw, (3, 3, cin, growth_rate), jnp.float32,
                               -bound, bound)
        b = jax.random.uniform(kb, (growth_rate,), jnp.float32, -bound, bound)
        dense.append((w, b))
        cin += growth_rate
    key, kw, kb = jax.random.split(key, 3)
    bound = 1.0 / math.sqrt(cin)
    w1 = jax.random.uniform(kw, (cin, in_channels), jnp.float32, -bound, bound)
    b1 = jax.random.uniform(kb, (in_channels,), jnp.float32, -bound, bound)
    return dense, (w1, b1)


if __name__ == "__main__":
    key = jax.random.PRNGKey(0)
    N, C, H, W = 2, 4, 16, 16           # x is NCHW, like the PyTorch module
    num_dense_layer, growth_rate = 3, 4

    key, kx = jax.random.split(key)
    x = jax.random.normal(kx, (N, C, H, W), jnp.float32)
    dense_params, final_params = init_params(key, C, num_dense_layer, growth_rate)

    out = rdb_pallas(x, dense_params, final_params)
    out = jax.block_until_ready(out)

    ref = rdb_reference(x, dense_params, final_params)
    assert out.shape == (N, C, H, W)
    # bf16 matmul operands with f32 accumulation vs. f32-HIGHEST reference.
    np.testing.assert_allclose(np.asarray(out), np.asarray(ref),
                               rtol=2e-2, atol=2e-2)
    print("KERNEL_OK")
</pallas_src>

<mosaic_0001>
module attributes {stable_mosaic.version = 11 : i64} {
  func.func @kernel(%arg0: i32, %arg1: memref<1x4x512xf32, #tpu.memory_space<vmem>>, %arg2: memref<1x384xf32, #tpu.memory_space<vmem>>, %arg3: memref<9x4x4xbf16, #tpu.memory_space<vmem>>, %arg4: memref<4x1xf32, #tpu.memory_space<vmem>>, %arg5: memref<9x4x8xbf16, #tpu.memory_space<vmem>>, %arg6: memref<4x1xf32, #tpu.memory_space<vmem>>, %arg7: memref<9x4x12xbf16, #tpu.memory_space<vmem>>, %arg8: memref<4x1xf32, #tpu.memory_space<vmem>>, %arg9: memref<4x16xbf16, #tpu.memory_space<vmem>>, %arg10: memref<4x1xf32, #tpu.memory_space<vmem>>, %arg11: memref<1x4x384xf32, #tpu.memory_space<vmem>>, %arg12: memref<16x512xbf16, #tpu.memory_space<vmem>>) attributes {dimension_semantics = [#tpu.dimension_semantics<parallel>], iteration_bounds = array<i64: 2>, scalar_prefetch = 0 : i64, scratch_operands = 1 : i64, tpu.core_type = #tpu.core_type<tc>, window_params = [{transform_indices = @transform_0, window_bounds = array<i64: 1, 4, 512>}, {pipeline_mode = #tpu.pipeline_mode<synchronous>, transform_indices = @transform_1, window_bounds = array<i64: 1, 384>}, {pipeline_mode = #tpu.pipeline_mode<synchronous>, transform_indices = @transform_2, window_bounds = array<i64: 9, 4, 4>}, {pipeline_mode = #tpu.pipeline_mode<synchronous>, transform_indices = @transform_3, window_bounds = array<i64: 4, 1>}, {pipeline_mode = #tpu.pipeline_mode<synchronous>, transform_indices = @transform_4, window_bounds = array<i64: 9, 4, 8>}, {pipeline_mode = #tpu.pipeline_mode<synchronous>, transform_indices = @transform_5, window_bounds = array<i64: 4, 1>}, {pipeline_mode = #tpu.pipeline_mode<synchronous>, transform_indices = @transform_6, window_bounds = array<i64: 9, 4, 12>}, {pipeline_mode = #tpu.pipeline_mode<synchronous>, transform_indices = @transform_7, window_bounds = array<i64: 4, 1>}, {pipeline_mode = #tpu.pipeline_mode<synchronous>, transform_indices = @transform_8, window_bounds = array<i64: 4, 16>}, {pipeline_mode = #tpu.pipeline_mode<synchronous>, transform_indices = @transform_9, window_bounds = array<i64: 4, 1>}, {transform_indices = @transform_10, window_bounds = array<i64: 1, 4, 384>}]} {
    %c0 = arith.constant 0 : index
    %c0_0 = arith.constant 0 : index
    %0 = vector.load %arg2[%c0, %c0_0] : memref<1x384xf32, #tpu.memory_space<vmem>>, vector<1x384xf32>
    %cst = arith.constant 5.000000e-01 : f32
    %1 = vector.broadcast %cst : f32 to vector<1x384xf32>
    %2 = arith.cmpf ogt, %0, %1 : vector<1x384xf32>
    %c0_1 = arith.constant 0 : index
    %c0_2 = arith.constant 0 : index
    %c0_3 = arith.constant 0 : index
    %3 = vector.load %arg1[%c0_1, %c0_2, %c0_3] : memref<1x4x512xf32, #tpu.memory_space<vmem>>, vector<1x4x512xf32>
    %4 = vector.shape_cast %3 : vector<1x4x512xf32> to vector<4x512xf32>
    %5 = arith.truncf %4 : vector<4x512xf32> to vector<4x512xbf16>
    %c0_4 = arith.constant 0 : index
    %c0_5 = arith.constant 0 : index
    %6 = vector.load %arg12[%c0_4, %c0_5] : memref<16x512xbf16, #tpu.memory_space<vmem>>, vector<4x512xbf16>
    tpu.vector_store %arg12[%c0_4, %c0_5], %5 {strides = array<i32>} : memref<16x512xbf16, #tpu.memory_space<vmem>>, vector<4x512xbf16>,
    %cst_6 = arith.constant 0.000000e+00 : bf16
    %7 = vector.broadcast %cst_6 : bf16 to vector<12x19xbf16>
    %c4 = arith.constant 4 : index
    %c0_7 = arith.constant 0 : index
    %8 = vector.load %arg12[%c4, %c0_7] : memref<16x512xbf16, #tpu.memory_space<vmem>>, vector<12x19xbf16>
    tpu.vector_store %arg12[%c4, %c0_7], %7 {strides = array<i32>} : memref<16x512xbf16, #tpu.memory_space<vmem>>, vector<12x19xbf16>,
    %cst_8 = arith.constant 0.000000e+00 : bf16
    %9 = vector.broadcast %cst_8 : bf16 to vector<12x109xbf16>
    %c4_9 = arith.constant 4 : index
    %c403 = arith.constant 403 : index
    %10 = vector.load %arg12[%c4_9, %c403] : memref<16x512xbf16, #tpu.memory_space<vmem>>, vector<12x109xbf16>
    tpu.vector_store %arg12[%c4_9, %c403], %9 {strides = array<i32>} : memref<16x512xbf16, #tpu.memory_space<vmem>>, vector<12x109xbf16>,
    %c0_10 = arith.constant 0 : index
    %c0_11 = arith.constant 0 : index
    %11 = vector.load %arg4[%c0_10, %c0_11] : memref<4x1xf32, #tpu.memory_space<vmem>>, vector<4x1xf32>
    %12 = vector.shape_cast %11 : vector<4x1xf32> to vector<4x1xf32>
    %13 = vector.broadcast %12 : vector<4x1xf32> to vector<4x384xf32>
    %c0_12 = arith.constant 0 : index
    %c0_13 = arith.constant 0 : index
    %14 = vector.load %arg12[%c0_12, %c0_13] : memref<16x512xbf16, #tpu.memory_space<vmem>>, vector<4x384xbf16>
    %c0_14 = arith.constant 0 : index
    %c0_15 = arith.constant 0 : index
    %c0_16 = arith.constant 0 : index
    %15 = vector.load %arg3[%c0_14, %c0_15, %c0_16] : memref<9x4x4xbf16, #tpu.memory_space<vmem>>, vector<1x4x4xbf16>
    %16 = vector.shape_cast %15 : vector<1x4x4xbf16> to vector<4x4xbf16>
    %cst_17 = arith.constant dense<0.000000e+00> : vector<4x384xf32>
    %17 = tpu.matmul %16, %14, %cst_17 {dimension_numbers = #tpu.dot_dimension_numbers<[1], [0], [0], [1], [0, 0, 1, 1], [], []>} : vector<4x4xbf16>, vector<4x384xbf16>, vector<4x384xf32> -> vector<4x384xf32>
    %18 = arith.addf %13, %17 : vector<4x384xf32>
    %c0_18 = arith.constant 0 : index
    %c1 = arith.constant 1 : index
    %19 = vector.load %arg12[%c0_18, %c1] : memref<16x512xbf16, #tpu.memory_space<vmem>>, vector<4x384xbf16>
    %c1_19 = arith.constant 1 : index
    %c0_20 = arith.constant 0 : index
    %c0_21 = arith.constant 0 : index
    %20 = vector.load %arg3[%c1_19, %c0_20, %c0_21] : memref<9x4x4xbf16, #tpu.memory_space<vmem>>, vector<1x4x4xbf16>
    %21 = vector.shape_cast %20 : vector<1x4x4xbf16> to vector<4x4xbf16>
    %cst_22 = arith.constant dense<0.000000e+00> : vector<4x384xf32>
    %22 = tpu.matmul %21, %19, %cst_22 {dimension_numbers = #tpu.dot_dimension_numbers<[1], [0], [0], [1], [0, 0, 1, 1], [], []>} : vector<4x4xbf16>, vector<4x384xbf16>, vector<4x384xf32> -> vector<4x384xf32>
    %23 = arith.addf %18, %22 : vector<4x384xf32>
    %c0_23 = arith.constant 0 : index
    %c2 = arith.constant 2 : index
    %24 = vector.load %arg12[%c0_23, %c2] : memref<16x512xbf16, #tpu.memory_space<vmem>>, vector<4x384xbf16>
    %c2_24 = arith.constant 2 : index
    %c0_25 = arith.constant 0 : index
    %c0_26 = arith.constant 0 : index
    %25 = vector.load %arg3[%c2_24, %c0_25, %c0_26] : memref<9x4x4xbf16, #tpu.memory_space<vmem>>, vector<1x4x4xbf16>
    %26 = vector.shape_cast %25 : vector<1x4x4xbf16> to vector<4x4xbf16>
    %cst_27 = arith.constant dense<0.000000e+00> : vector<4x384xf32>
    %27 = tpu.matmul %26, %24, %cst_27 {dimension_numbers = #tpu.dot_dimension_numbers<[1], [0], [0], [1], [0, 0, 1, 1], [], []>} : vector<4x4xbf16>, vector<4x384xbf16>, vector<4x384xf32> -> vector<4x384xf32>
    %28 = arith.addf %23, %27 : vector<4x384xf32>
    %c0_28 = arith.constant 0 : index
    %c18 = arith.constant 18 : index
    %29 = vector.load %arg12[%c0_28, %c18] : memref<16x512xbf16, #tpu.memory_space<vmem>>, vector<4x384xbf16>
    %c3 = arith.constant 3 : index
    %c0_29 = arith.constant 0 : index
    %c0_30 = arith.constant 0 : index
    %30 = vector.load %arg3[%c3, %c0_29, %c0_30] : memref<9x4x4xbf16, #tpu.memory_space<vmem>>, vector<1x4x4xbf16>
    %31 = vector.shape_cast %30 : vector<1x4x4xbf16> to vector<4x4xbf16>
    %cst_31 = arith.constant dense<0.000000e+00> : vector<4x384xf32>
    %32 = tpu.matmul %31, %29, %cst_31 {dimension_numbers = #tpu.dot_dimension_numbers<[1], [0], [0], [1], [0, 0, 1, 1], [], []>} : vector<4x4xbf16>, vector<4x384xbf16>, vector<4x384xf32> -> vector<4x384xf32>
    %33 = arith.addf %28, %32 : vector<4x384xf32>
    %c0_32 = arith.constant 0 : index
    %c19 = arith.constant 19 : index
    %34 = vector.load %arg12[%c0_32, %c19] : memref<16x512xbf16, #tpu.memory_space<vmem>>, vector<4x384xbf16>
    %c4_33 = arith.constant 4 : index
    %c0_34 = arith.constant 0 : index
    %c0_35 = arith.constant 0 : index
    %35 = vector.load %arg3[%c4_33, %c0_34, %c0_35] : memref<9x4x4xbf16, #tpu.memory_space<vmem>>, vector<1x4x4xbf16>
    %36 = vector.shape_cast %35 : vector<1x4x4xbf16> to vector<4x4xbf16>
    %cst_36 = arith.constant dense<0.000000e+00> : vector<4x384xf32>
    %37 = tpu.matmul %36, %34, %cst_36 {dimension_numbers = #tpu.dot_dimension_numbers<[1], [0], [0], [1], [0, 0, 1, 1], [], []>} : vector<4x4xbf16>, vector<4x384xbf16>, vector<4x384xf32> -> vector<4x384xf32>
    %38 = arith.addf %33, %37 : vector<4x384xf32>
    %c0_37 = arith.constant 0 : index
    %c20 = arith.constant 20 : index
    %39 = vector.load %arg12[%c0_37, %c20] : memref<16x512xbf16, #tpu.memory_space<vmem>>, vector<4x384xbf16>
    %c5 = arith.constant 5 : index
    %c0_38 = arith.constant 0 : index
    %c0_39 = arith.constant 0 : index
    %40 = vector.load %arg3[%c5, %c0_38, %c0_39] : memref<9x4x4xbf16, #tpu.memory_space<vmem>>, vector<1x4x4xbf16>
    %41 = vector.shape_cast %40 : vector<1x4x4xbf16> to vector<4x4xbf16>
    %cst_40 = arith.constant dense<0.000000e+00> : vector<4x384xf32>
    %42 = tpu.matmul %41, %39, %cst_40 {dimension_numbers = #tpu.dot_dimension_numbers<[1], [0], [0], [1], [0, 0, 1, 1], [], []>} : vector<4x4xbf16>, vector<4x384xbf16>, vector<4x384xf32> -> vector<4x384xf32>
    %43 = arith.addf %38, %42 : vector<4x384xf32>
    %c0_41 = arith.constant 0 : index
    %c36 = arith.constant 36 : index
    %44 = vector.load %arg12[%c0_41, %c36] : memref<16x512xbf16, #tpu.memory_space<vmem>>, vector<4x384xbf16>
    %c6 = arith.constant 6 : index
    %c0_42 = arith.constant 0 : index
    %c0_43 = arith.constant 0 : index
    %45 = vector.load %arg3[%c6, %c0_42, %c0_43] : memref<9x4x4xbf16, #tpu.memory_space<vmem>>, vector<1x4x4xbf16>
    %46 = vector.shape_cast %45 : vector<1x4x4xbf16> to vector<4x4xbf16>
    %cst_44 = arith.constant dense<0.000000e+00> : vector<4x384xf32>
    %47 = tpu.matmul %46, %44, %cst_44 {dimension_numbers = #tpu.dot_dimension_numbers<[1], [0], [0], [1], [0, 0, 1, 1], [], []>} : vector<4x4xbf16>, vector<4x384xbf16>, vector<4x384xf32> -> vector<4x384xf32>
    %48 = arith.addf %43, %47 : vector<4x384xf32>
    %c0_45 = arith.constant 0 : index
    %c37 = arith.constant 37 : index
    %49 = vector.load %arg12[%c0_45, %c37] : memref<16x512xbf16, #tpu.memory_space<vmem>>, vector<4x384xbf16>
    %c7 = arith.constant 7 : index
    %c0_46 = arith.constant 0 : index
    %c0_47 = arith.constant 0 : index
    %50 = vector.load %arg3[%c7, %c0_46, %c0_47] : memref<9x4x4xbf16, #tpu.memory_space<vmem>>, vector<1x4x4xbf16>
    %51 = vector.shape_cast %50 : vector<1x4x4xbf16> to vector<4x4xbf16>
    %cst_48 = arith.constant dense<0.000000e+00> : vector<4x384xf32>
    %52 = tpu.matmul %51, %49, %cst_48 {dimension_numbers = #tpu.dot_dimension_numbers<[1], [0], [0], [1], [0, 0, 1, 1], [], []>} : vector<4x4xbf16>, vector<4x384xbf16>, vector<4x384xf32> -> vector<4x384xf32>
    %53 = arith.addf %48, %52 : vector<4x384xf32>
    %c0_49 = arith.constant 0 : index
    %c38 = arith.constant 38 : index
    %54 = vector.load %arg12[%c0_49, %c38] : memref<16x512xbf16, #tpu.memory_space<vmem>>, vector<4x384xbf16>
    %c8 = arith.constant 8 : index
    %c0_50 = arith.constant 0 : index
    %c0_51 = arith.constant 0 : index
    %55 = vector.load %arg3[%c8, %c0_50, %c0_51] : memref<9x4x4xbf16, #tpu.memory_space<vmem>>, vector<1x4x4xbf16>
    %56 = vector.shape_cast %55 : vector<1x4x4xbf16> to vector<4x4xbf16>
    %cst_52 = arith.constant dense<0.000000e+00> : vector<4x384xf32>
    %57 = tpu.matmul %56, %54, %cst_52 {dimension_numbers = #tpu.dot_dimension_numbers<[1], [0], [0], [1], [0, 0, 1, 1], [], []>} : vector<4x4xbf16>, vector<4x384xbf16>, vector<4x384xf32> -> vector<4x384xf32>
    %58 = arith.addf %53, %57 : vector<4x384xf32>
    %cst_53 = arith.constant 0.000000e+00 : f32
    %59 = vector.broadcast %cst_53 : f32 to vector<4x384xf32>
    %60 = arith.maximumf %58, %59 : vector<4x384xf32>
    %cst_54 = arith.constant 0.000000e+00 : f32
    %61 = vector.shape_cast %2 : vector<1x384xi1> to vector<1x384xi1>
    %62 = vector.broadcast %61 : vector<1x384xi1> to vector<4x384xi1>
    %63 = vector.broadcast %cst_54 : f32 to vector<4x384xf32>
    %64 = arith.select %62, %60, %63 : vector<4x384xi1>, vector<4x384xf32>
    %65 = arith.truncf %64 : vector<4x384xf32> to vector<4x384xbf16>
    %c4_55 = arith.constant 4 : index
    %c19_56 = arith.constant 19 : index
    %66 = vector.load %arg12[%c4_55, %c19_56] : memref<16x512xbf16, #tpu.memory_space<vmem>>, vector<4x384xbf16>
    tpu.vector_store %arg12[%c4_55, %c19_56], %65 {strides = array<i32>} : memref<16x512xbf16, #tpu.memory_space<vmem>>, vector<4x384xbf16>,
    %c0_57 = arith.constant 0 : index
    %c0_58 = arith.constant 0 : index
    %67 = vector.load %arg6[%c0_57, %c0_58] : memref<4x1xf32, #tpu.memory_space<vmem>>, vector<4x1xf32>
    %68 = vector.shape_cast %67 : vector<4x1xf32> to vector<4x1xf32>
    %69 = vector.broadcast %68 : vector<4x1xf32> to vector<4x384xf32>
    %c0_59 = arith.constant 0 : index
    %c0_60 = arith.constant 0 : index
    %70 = vector.load %arg12[%c0_59, %c0_60] : memref<16x512xbf16, #tpu.memory_space<vmem>>, vector<8x384xbf16>
    %c0_61 = arith.constant 0 : index
    %c0_62 = arith.constant 0 : index
    %c0_63 = arith.constant 0 : index
    %71 = vector.load %arg5[%c0_61, %c0_62, %c0_63] : memref<9x4x8xbf16, #tpu.memory_space<vmem>>, vector<1x4x8xbf16>
    %72 = vector.shape_cast %71 : vector<1x4x8xbf16> to vector<4x8xbf16>
    %cst_64 = arith.constant dense<0.000000e+00> : vector<4x384xf32>
    %73 = tpu.matmul %72, %70, %cst_64 {dimension_numbers = #tpu.dot_dimension_numbers<[1], [0], [0], [1], [0, 0, 1, 1], [], []>} : vector<4x8xbf16>, vector<8x384xbf16>, vector<4x384xf32> -> vector<4x384xf32>
    %74 = arith.addf %69, %73 : vector<4x384xf32>
    %c0_65 = arith.constant 0 : index
    %c1_66 = arith.constant 1 : index
    %75 = vector.load %arg12[%c0_65, %c1_66] : memref<16x512xbf16, #tpu.memory_space<vmem>>, vector<8x384xbf16>
    %c1_67 = arith.constant 1 : index
    %c0_68 = arith.constant 0 : index
    %c0_69 = arith.constant 0 : index
    %76 = vector.load %arg5[%c1_67, %c0_68, %c0_69] : memref<9x4x8xbf16, #tpu.memory_space<vmem>>, vector<1x4x8xbf16>
    %77 = vector.shape_cast %76 : vector<1x4x8xbf16> to vector<4x8xbf16>
    %cst_70 = arith.constant dense<0.000000e+00> : vector<4x384xf32>
    %78 = tpu.matmul %77, %75, %cst_70 {dimension_numbers = #tpu.dot_dimension_numbers<[1], [0], [0], [1], [0, 0, 1, 1], [], []>} : vector<4x8xbf16>, vector<8x384xbf16>, vector<4x384xf32> -> vector<4x384xf32>
    %79 = arith.addf %74, %78 : vector<4x384xf32>
    %c0_71 = arith.constant 0 : index
    %c2_72 = arith.constant 2 : index
    %80 = vector.load %arg12[%c0_71, %c2_72] : memref<16x512xbf16, #tpu.memory_space<vmem>>, vector<8x384xbf16>
    %c2_73 = arith.constant 2 : index
    %c0_74 = arith.constant 0 : index
    %c0_75 = arith.constant 0 : index
    %81 = vector.load %arg5[%c2_73, %c0_74, %c0_75] : memref<9x4x8xbf16, #tpu.memory_space<vmem>>, vector<1x4x8xbf16>
    %82 = vector.shape_cast %81 : vector<1x4x8xbf16> to vector<4x8xbf16>
    %cst_76 = arith.constant dense<0.000000e+00> : vector<4x384xf32>
    %83 = tpu.matmul %82, %80, %cst_76 {dimension_numbers = #tpu.dot_dimension_numbers<[1], [0], [0], [1], [0, 0, 1, 1], [], []>} : vector<4x8xbf16>, vector<8x384xbf16>, vector<4x384xf32> -> vector<4x384xf32>
    %84 = arith.addf %79, %83 : vector<4x384xf32>
    %c0_77 = arith.constant 0 : index
    %c18_78 = arith.constant 18 : index
    %85 = vector.load %arg12[%c0_77, %c18_78] : memref<16x512xbf16, #tpu.memory_space<vmem>>, vector<8x384xbf16>
    %c3_79 = arith.constant 3 : index
    %c0_80 = arith.constant 0 : index
    %c0_81 = arith.constant 0 : index
    %86 = vector.load %arg5[%c3_79, %c0_80, %c0_81] : memref<9x4x8xbf16, #tpu.memory_space<vmem>>, vector<1x4x8xbf16>
    %87 = vector.shape_cast %86 : vector<1x4x8xbf16> to vector<4x8xbf16>
    %cst_82 = arith.constant dense<0.000000e+00> : vector<4x384xf32>
    %88 = tpu.matmul %87, %85, %cst_82 {dimension_numbers = #tpu.dot_dimension_numbers<[1], [0], [0], [1], [0, 0, 1, 1], [], []>} : vector<4x8xbf16>, vector<8x384xbf16>, vector<4x384xf32> -> vector<4x384xf32>
    %89 = arith.addf %84, %88 : vector<4x384xf32>
    %c0_83 = arith.constant 0 : index
    %c19_84 = arith.constant 19 : index
    %90 = vector.load %arg12[%c0_83, %c19_84] : memref<16x512xbf16, #tpu.memory_space<vmem>>, vector<8x384xbf16>
    %c4_85 = arith.constant 4 : index
    %c0_86 = arith.constant 0 : index
    %c0_87 = arith.constant 0 : index
    %91 = vector.load %arg5[%c4_85, %c0_86, %c0_87] : memref<9x4x8xbf16, #tpu.memory_space<vmem>>, vector<1x4x8xbf16>
    %92 = vector.shape_cast %91 : vector<1x4x8xbf16> to vector<4x8xbf16>
    %cst_88 = arith.constant dense<0.000000e+00> : vector<4x384xf32>
    %93 = tpu.matmul %92, %90, %cst_88 {dimension_numbers = #tpu.dot_dimension_numbers<[1], [0], [0], [1], [0, 0, 1, 1], [], []>} : vector<4x8xbf16>, vector<8x384xbf16>, vector<4x384xf32> -> vector<4x384xf32>
    %94 = arith.addf %89, %93 : vector<4x384xf32>
    %c0_89 = arith.constant 0 : index
    %c20_90 = arith.constant 20 : index
    %95 = vector.load %arg12[%c0_89, %c20_90] : memref<16x512xbf16, #tpu.memory_space<vmem>>, vector<8x384xbf16>
    %c5_91 = arith.constant 5 : index
    %c0_92 = arith.constant 0 : index
    %c0_93 = arith.constant 0 : index
    %96 = vector.load %arg5[%c5_91, %c0_92, %c0_93] : memref<9x4x8xbf16, #tpu.memory_space<vmem>>, vector<1x4x8xbf16>
    %97 = vector.shape_cast %96 : vector<1x4x8xbf16> to vector<4x8xbf16>
    %cst_94 = arith.constant dense<0.000000e+00> : vector<4x384xf32>
    %98 = tpu.matmul %97, %95, %cst_94 {dimension_numbers = #tpu.dot_dimension_numbers<[1], [0], [0], [1], [0, 0, 1, 1], [], []>} : vector<4x8xbf16>, vector<8x384xbf16>, vector<4x384xf32> -> vector<4x384xf32>
    %99 = arith.addf %94, %98 : vector<4x384xf32>
    %c0_95 = arith.constant 0 : index
    %c36_96 = arith.constant 36 : index
    %100 = vector.load %arg12[%c0_95, %c36_96] : memref<16x512xbf16, #tpu.memory_space<vmem>>, vector<8x384xbf16>
    %c6_97 = arith.constant 6 : index
    %c0_98 = arith.constant 0 : index
    %c0_99 = arith.constant 0 : index
    %101 = vector.load %arg5[%c6_97, %c0_98, %c0_99] : memref<9x4x8xbf16, #tpu.memory_space<vmem>>, vector<1x4x8xbf16>
    %102 = vector.shape_cast %101 : vector<1x4x8xbf16> to vector<4x8xbf16>
    %cst_100 = arith.constant dense<0.000000e+00> : vector<4x384xf32>
    %103 = tpu.matmul %102, %100, %cst_100 {dimension_numbers = #tpu.dot_dimension_numbers<[1], [0], [0], [1], [0, 0, 1, 1], [], []>} : vector<4x8xbf16>, vector<8x384xbf16>, vector<4x384xf32> -> vector<4x384xf32>
    %104 = arith.addf %99, %103 : vector<4x384xf32>
    %c0_101 = arith.constant 0 : index
    %c37_102 = arith.constant 37 : index
    %105 = vector.load %arg12[%c0_101, %c37_102] : memref<16x512xbf16, #tpu.memory_space<vmem>>, vector<8x384xbf16>
    %c7_103 = arith.constant 7 : index
    %c0_104 = arith.constant 0 : index
    %c0_105 = arith.constant 0 : index
    %106 = vector.load %arg5[%c7_103, %c0_104, %c0_105] : memref<9x4x8xbf16, #tpu.memory_space<vmem>>, vector<1x4x8xbf16>
    %107 = vector.shape_cast %106 : vector<1x4x8xbf16> to vector<4x8xbf16>
    %cst_106 = arith.constant dense<0.000000e+00> : vector<4x384xf32>
    %108 = tpu.matmul %107, %105, %cst_106 {dimension_numbers = #tpu.dot_dimension_numbers<[1], [0], [0], [1], [0, 0, 1, 1], [], []>} : vector<4x8xbf16>, vector<8x384xbf16>, vector<4x384xf32> -> vector<4x384xf32>
    %109 = arith.addf %104, %108 : vector<4x384xf32>
    %c0_107 = arith.constant 0 : index
    %c38_108 = arith.constant 38 : index
    %110 = vector.load %arg12[%c0_107, %c38_108] : memref<16x512xbf16, #tpu.memory_space<vmem>>, vector<8x384xbf16>
    %c8_109 = arith.constant 8 : index
    %c0_110 = arith.constant 0 : index
    %c0_111 = arith.constant 0 : index
    %111 = vector.load %arg5[%c8_109, %c0_110, %c0_111] : memref<9x4x8xbf16, #tpu.memory_space<vmem>>, vector<1x4x8xbf16>
    %112 = vector.shape_cast %111 : vector<1x4x8xbf16> to vector<4x8xbf16>
    %cst_112 = arith.constant dense<0.000000e+00> : vector<4x384xf32>
    %113 = tpu.matmul %112, %110, %cst_112 {dimension_numbers = #tpu.dot_dimension_numbers<[1], [0], [0], [1], [0, 0, 1, 1], [], []>} : vector<4x8xbf16>, vector<8x384xbf16>, vector<4x384xf32> -> vector<4x384xf32>
    %114 = arith.addf %109, %113 : vector<4x384xf32>
    %cst_113 = arith.constant 0.000000e+00 : f32
    %115 = vector.broadcast %cst_113 : f32 to vector<4x384xf32>
    %116 = arith.maximumf %114, %115 : vector<4x384xf32>
    %cst_114 = arith.constant 0.000000e+00 : f32
    %117 = vector.shape_cast %2 : vector<1x384xi1> to vector<1x384xi1>
    %118 = vector.broadcast %117 : vector<1x384xi1> to vector<4x384xi1>
    %119 = vector.broadcast %cst_114 : f32 to vector<4x384xf32>
    %120 = arith.select %118, %116, %119 : vector<4x384xi1>, vector<4x384xf32>
    %121 = arith.truncf %120 : vector<4x384xf32> to vector<4x384xbf16>
    %c8_115 = arith.constant 8 : index
    %c19_116 = arith.constant 19 : index
    %122 = vector.load %arg12[%c8_115, %c19_116] : memref<16x512xbf16, #tpu.memory_space<vmem>>, vector<4x384xbf16>
    tpu.vector_store %arg12[%c8_115, %c19_116], %121 {strides = array<i32>} : memref<16x512xbf16, #tpu.memory_space<vmem>>, vector<4x384xbf16>,
    %c0_117 = arith.constant 0 : index
    %c0_118 = arith.constant 0 : index
    %123 = vector.load %arg8[%c0_117, %c0_118] : memref<4x1xf32, #tpu.memory_space<vmem>>, vector<4x1xf32>
    %124 = vector.shape_cast %123 : vector<4x1xf32> to vector<4x1xf32>
    %125 = vector.broadcast %124 : vector<4x1xf32> to vector<4x384xf32>
    %c0_119 = arith.constant 0 : index
    %c0_120 = arith.constant 0 : index
    %126 = vector.load %arg12[%c0_119, %c0_120] : memref<16x512xbf16, #tpu.memory_space<vmem>>, vector<12x384xbf16>
    %c0_121 = arith.constant 0 : index
    %c0_122 = arith.constant 0 : index
    %c0_123 = arith.constant 0 : index
    %127 = vector.load %arg7[%c0_121, %c0_122, %c0_123] : memref<9x4x12xbf16, #tpu.memory_space<vmem>>, vector<1x4x12xbf16>
    %128 = vector.shape_cast %127 : vector<1x4x12xbf16> to vector<4x12xbf16>
    %cst_124 = arith.constant dense<0.000000e+00> : vector<4x384xf32>
    %129 = tpu.matmul %128, %126, %cst_124 {dimension_numbers = #tpu.dot_dimension_numbers<[1], [0], [0], [1], [0, 0, 1, 1], [], []>} : vector<4x12xbf16>, vector<12x384xbf16>, vector<4x384xf32> -> vector<4x384xf32>
    %130 = arith.addf %125, %129 : vector<4x384xf32>
    %c0_125 = arith.constant 0 : index
    %c1_126 = arith.constant 1 : index
    %131 = vector.load %arg12[%c0_125, %c1_126] : memref<16x512xbf16, #tpu.memory_space<vmem>>, vector<12x384xbf16>
    %c1_127 = arith.constant 1 : index
    %c0_128 = arith.constant 0 : index
    %c0_129 = arith.constant 0 : index
    %132 = vector.load %arg7[%c1_127, %c0_128, %c0_129] : memref<9x4x12xbf16, #tpu.memory_space<vmem>>, vector<1x4x12xbf16>
    %133 = vector.shape_cast %132 : vector<1x4x12xbf16> to vector<4x12xbf16>
    %cst_130 = arith.constant dense<0.000000e+00> : vector<4x384xf32>
    %134 = tpu.matmul %133, %131, %cst_130 {dimension_numbers = #tpu.dot_dimension_numbers<[1], [0], [0], [1], [0, 0, 1, 1], [], []>} : vector<4x12xbf16>, vector<12x384xbf16>, vector<4x384xf32> -> vector<4x384xf32>
    %135 = arith.addf %130, %134 : vector<4x384xf32>
    %c0_131 = arith.constant 0 : index
    %c2_132 = arith.constant 2 : index
    %136 = vector.load %arg12[%c0_131, %c2_132] : memref<16x512xbf16, #tpu.memory_space<vmem>>, vector<12x384xbf16>
    %c2_133 = arith.constant 2 : index
    %c0_134 = arith.constant 0 : index
    %c0_135 = arith.constant 0 : index
    %137 = vector.load %arg7[%c2_133, %c0_134, %c0_135] : memref<9x4x12xbf16, #tpu.memory_space<vmem>>, vector<1x4x12xbf16>
    %138 = vector.shape_cast %137 : vector<1x4x12xbf16> to vector<4x12xbf16>
    %cst_136 = arith.constant dense<0.000000e+00> : vector<4x384xf32>
    %139 = tpu.matmul %138, %136, %cst_136 {dimension_numbers = #tpu.dot_dimension_numbers<[1], [0], [0], [1], [0, 0, 1, 1], [], []>} : vector<4x12xbf16>, vector<12x384xbf16>, vector<4x384xf32> -> vector<4x384xf32>
    %140 = arith.addf %135, %139 : vector<4x384xf32>
    %c0_137 = arith.constant 0 : index
    %c18_138 = arith.constant 18 : index
    %141 = vector.load %arg12[%c0_137, %c18_138] : memref<16x512xbf16, #tpu.memory_space<vmem>>, vector<12x384xbf16>
    %c3_139 = arith.constant 3 : index
    %c0_140 = arith.constant 0 : index
    %c0_141 = arith.constant 0 : index
    %142 = vector.load %arg7[%c3_139, %c0_140, %c0_141] : memref<9x4x12xbf16, #tpu.memory_space<vmem>>, vector<1x4x12xbf16>
    %143 = vector.shape_cast %142 : vector<1x4x12xbf16> to vector<4x12xbf16>
    %cst_142 = arith.constant dense<0.000000e+00> : vector<4x384xf32>
    %144 = tpu.matmul %143, %141, %cst_142 {dimension_numbers = #tpu.dot_dimension_numbers<[1], [0], [0], [1], [0, 0, 1, 1], [], []>} : vector<4x12xbf16>, vector<12x384xbf16>, vector<4x384xf32> -> vector<4x384xf32>
    %145 = arith.addf %140, %144 : vector<4x384xf32>
    %c0_143 = arith.constant 0 : index
    %c19_144 = arith.constant 19 : index
    %146 = vector.load %arg12[%c0_143, %c19_144] : memref<16x512xbf16, #tpu.memory_space<vmem>>, vector<12x384xbf16>
    %c4_145 = arith.constant 4 : index
    %c0_146 = arith.constant 0 : index
    %c0_147 = arith.constant 0 : index
    %147 = vector.load %arg7[%c4_145, %c0_146, %c0_147] : memref<9x4x12xbf16, #tpu.memory_space<vmem>>, vector<1x4x12xbf16>
    %148 = vector.shape_cast %147 : vector<1x4x12xbf16> to vector<4x12xbf16>
    %cst_148 = arith.constant dense<0.000000e+00> : vector<4x384xf32>
    %149 = tpu.matmul %148, %146, %cst_148 {dimension_numbers = #tpu.dot_dimension_numbers<[1], [0], [0], [1], [0, 0, 1, 1], [], []>} : vector<4x12xbf16>, vector<12x384xbf16>, vector<4x384xf32> -> vector<4x384xf32>
    %150 = arith.addf %145, %149 : vector<4x384xf32>
    %c0_149 = arith.constant 0 : index
    %c20_150 = arith.constant 20 : index
    %151 = vector.load %arg12[%c0_149, %c20_150] : memref<16x512xbf16, #tpu.memory_space<vmem>>, vector<12x384xbf16>
    %c5_151 = arith.constant 5 : index
    %c0_152 = arith.constant 0 : index
    %c0_153 = arith.constant 0 : index
    %152 = vector.load %arg7[%c5_151, %c0_152, %c0_153] : memref<9x4x12xbf16, #tpu.memory_space<vmem>>, vector<1x4x12xbf16>
    %153 = vector.shape_cast %152 : vector<1x4x12xbf16> to vector<4x12xbf16>
    %cst_154 = arith.constant dense<0.000000e+00> : vector<4x384xf32>
    %154 = tpu.matmul %153, %151, %cst_154 {dimension_numbers = #tpu.dot_dimension_numbers<[1], [0], [0], [1], [0, 0, 1, 1], [], []>} : vector<4x12xbf16>, vector<12x384xbf16>, vector<4x384xf32> -> vector<4x384xf32>
    %155 = arith.addf %150, %154 : vector<4x384xf32>
    %c0_155 = arith.constant 0 : index
    %c36_156 = arith.constant 36 : index
    %156 = vector.load %arg12[%c0_155, %c36_156] : memref<16x512xbf16, #tpu.memory_space<vmem>>, vector<12x384xbf16>
    %c6_157 = arith.constant 6 : index
    %c0_158 = arith.constant 0 : index
    %c0_159 = arith.constant 0 : index
    %157 = vector.load %arg7[%c6_157, %c0_158, %c0_159] : memref<9x4x12xbf16, #tpu.memory_space<vmem>>, vector<1x4x12xbf16>
    %158 = vector.shape_cast %157 : vector<1x4x12xbf16> to vector<4x12xbf16>
    %cst_160 = arith.constant dense<0.000000e+00> : vector<4x384xf32>
    %159 = tpu.matmul %158, %156, %cst_160 {dimension_numbers = #tpu.dot_dimension_numbers<[1], [0], [0], [1], [0, 0, 1, 1], [], []>} : vector<4x12xbf16>, vector<12x384xbf16>, vector<4x384xf32> -> vector<4x384xf32>
    %160 = arith.addf %155, %159 : vector<4x384xf32>
    %c0_161 = arith.constant 0 : index
    %c37_162 = arith.constant 37 : index
    %161 = vector.load %arg12[%c0_161, %c37_162] : memref<16x512xbf16, #tpu.memory_space<vmem>>, vector<12x384xbf16>
    %c7_163 = arith.constant 7 : index
    %c0_164 = arith.constant 0 : index
    %c0_165 = arith.constant 0 : index
    %162 = vector.load %arg7[%c7_163, %c0_164, %c0_165] : memref<9x4x12xbf16, #tpu.memory_space<vmem>>, vector<1x4x12xbf16>
    %163 = vector.shape_cast %162 : vector<1x4x12xbf16> to vector<4x12xbf16>
    %cst_166 = arith.constant dense<0.000000e+00> : vector<4x384xf32>
    %164 = tpu.matmul %163, %161, %cst_166 {dimension_numbers = #tpu.dot_dimension_numbers<[1], [0], [0], [1], [0, 0, 1, 1], [], []>} : vector<4x12xbf16>, vector<12x384xbf16>, vector<4x384xf32> -> vector<4x384xf32>
    %165 = arith.addf %160, %164 : vector<4x384xf32>
    %c0_167 = arith.constant 0 : index
    %c38_168 = arith.constant 38 : index
    %166 = vector.load %arg12[%c0_167, %c38_168] : memref<16x512xbf16, #tpu.memory_space<vmem>>, vector<12x384xbf16>
    %c8_169 = arith.constant 8 : index
    %c0_170 = arith.constant 0 : index
    %c0_171 = arith.constant 0 : index
    %167 = vector.load %arg7[%c8_169, %c0_170, %c0_171] : memref<9x4x12xbf16, #tpu.memory_space<vmem>>, vector<1x4x12xbf16>
    %168 = vector.shape_cast %167 : vector<1x4x12xbf16> to vector<4x12xbf16>
    %cst_172 = arith.constant dense<0.000000e+00> : vector<4x384xf32>
    %169 = tpu.matmul %168, %166, %cst_172 {dimension_numbers = #tpu.dot_dimension_numbers<[1], [0], [0], [1], [0, 0, 1, 1], [], []>} : vector<4x12xbf16>, vector<12x384xbf16>, vector<4x384xf32> -> vector<4x384xf32>
    %170 = arith.addf %165, %169 : vector<4x384xf32>
    %cst_173 = arith.constant 0.000000e+00 : f32
    %171 = vector.broadcast %cst_173 : f32 to vector<4x384xf32>
    %172 = arith.maximumf %170, %171 : vector<4x384xf32>
    %cst_174 = arith.constant 0.000000e+00 : f32
    %173 = vector.shape_cast %2 : vector<1x384xi1> to vector<1x384xi1>
    %174 = vector.broadcast %173 : vector<1x384xi1> to vector<4x384xi1>
    %175 = vector.broadcast %cst_174 : f32 to vector<4x384xf32>
    %176 = arith.select %174, %172, %175 : vector<4x384xi1>, vector<4x384xf32>
    %177 = arith.truncf %176 : vector<4x384xf32> to vector<4x384xbf16>
    %c12 = arith.constant 12 : index
    %c19_175 = arith.constant 19 : index
    %178 = vector.load %arg12[%c12, %c19_175] : memref<16x512xbf16, #tpu.memory_space<vmem>>, vector<4x384xbf16>
    tpu.vector_store %arg12[%c12, %c19_175], %177 {strides = array<i32>} : memref<16x512xbf16, #tpu.memory_space<vmem>>, vector<4x384xbf16>,
    %c0_176 = arith.constant 0 : index
    %c19_177 = arith.constant 19 : index
    %179 = vector.load %arg12[%c0_176, %c19_177] : memref<16x512xbf16, #tpu.memory_space<vmem>>, vector<16x384xbf16>
    %c0_178 = arith.constant 0 : index
    %c0_179 = arith.constant 0 : index
    %c19_180 = arith.constant 19 : index
    %180 = vector.load %arg1[%c0_178, %c0_179, %c19_180] : memref<1x4x512xf32, #tpu.memory_space<vmem>>, vector<1x4x384xf32>
    %181 = vector.shape_cast %180 : vector<1x4x384xf32> to vector<4x384xf32>
    %c0_181 = arith.constant 0 : index
    %c0_182 = arith.constant 0 : index
    %182 = vector.load %arg10[%c0_181, %c0_182] : memref<4x1xf32, #tpu.memory_space<vmem>>, vector<4x1xf32>
    %183 = vector.broadcast %182 : vector<4x1xf32> to vector<4x384xf32>
    %184 = arith.addf %181, %183 : vector<4x384xf32>
    %c0_183 = arith.constant 0 : index
    %c0_184 = arith.constant 0 : index
    %185 = vector.load %arg9[%c0_183, %c0_184] : memref<4x16xbf16, #tpu.memory_space<vmem>>, vector<4x16xbf16>
    %cst_185 = arith.constant dense<0.000000e+00> : vector<4x384xf32>
    %186 = tpu.matmul %185, %179, %cst_185 {dimension_numbers = #tpu.dot_dimension_numbers<[1], [0], [0], [1], [0, 0, 1, 1], [], []>} : vector<4x16xbf16>, vector<16x384xbf16>, vector<4x384xf32> -> vector<4x384xf32>
    %187 = arith.addf %184, %186 : vector<4x384xf32>
    %c0_186 = arith.constant 0 : index
    %c0_187 = arith.constant 0 : index
    %c0_188 = arith.constant 0 : index
    %188 = vector.load %arg11[%c0_186, %c0_187, %c0_188] : memref<1x4x384xf32, #tpu.memory_space<vmem>>, vector<1x4x384xf32>
    %189 = vector.shape_cast %188 : vector<1x4x384xf32> to vector<4x384xf32>
    %190 = vector.shape_cast %187 : vector<4x384xf32> to vector<1x4x384xf32>
    tpu.vector_store %arg11[%c0_186, %c0_187, %c0_188], %190 {strides = array<i32>} : memref<1x4x384xf32, #tpu.memory_space<vmem>>, vector<1x4x384xf32>,
    return
  }
  func.func @transform_0(%arg0: i32) -> (i32, i32, i32) {
    %c0_i32 = arith.constant 0 : i32
    %c0_i32_0 = arith.constant 0 : i32
    %c0_i32_1 = arith.constant 0 : i32
    return %arg0, %c0_i32, %c0_i32_0 : i32, i32, i32
  }
  func.func @transform_1(%arg0: i32) -> (i32, i32) {
    %c0_i32 = arith.constant 0 : i32
    %c0_i32_0 = arith.constant 0 : i32
    %c0_i32_1 = arith.constant 0 : i32
    return %c0_i32, %c0_i32_0 : i32, i32
  }
  func.func @transform_2(%arg0: i32) -> (i32, i32, i32) {
    %c0_i32 = arith.constant 0 : i32
    %c0_i32_0 = arith.constant 0 : i32
    %c0_i32_1 = arith.constant 0 : i32
    %c0_i32_2 = arith.constant 0 : i32
    return %c0_i32, %c0_i32_0, %c0_i32_1 : i32, i32, i32
  }
  func.func @transform_3(%arg0: i32) -> (i32, i32) {
    %c0_i32 = arith.constant 0 : i32
    %c0_i32_0 = arith.constant 0 : i32
    %c0_i32_1 = arith.constant 0 : i32
    return %c0_i32, %c0_i32_0 : i32, i32
  }
  func.func @transform_4(%arg0: i32) -> (i32, i32, i32) {
    %c0_i32 = arith.constant 0 : i32
    %c0_i32_0 = arith.constant 0 : i32
    %c0_i32_1 = arith.constant 0 : i32
    %c0_i32_2 = arith.constant 0 : i32
    return %c0_i32, %c0_i32_0, %c0_i32_1 : i32, i32, i32
  }
  func.func @transform_5(%arg0: i32) -> (i32, i32) {
    %c0_i32 = arith.constant 0 : i32
    %c0_i32_0 = arith.constant 0 : i32
    %c0_i32_1 = arith.constant 0 : i32
    return %c0_i32, %c0_i32_0 : i32, i32
  }
  func.func @transform_6(%arg0: i32) -> (i32, i32, i32) {
    %c0_i32 = arith.constant 0 : i32
    %c0_i32_0 = arith.constant 0 : i32
    %c0_i32_1 = arith.constant 0 : i32
    %c0_i32_2 = arith.constant 0 : i32
    return %c0_i32, %c0_i32_0, %c0_i32_1 : i32, i32, i32
  }
  func.func @transform_7(%arg0: i32) -> (i32, i32) {
    %c0_i32 = arith.constant 0 : i32
    %c0_i32_0 = arith.constant 0 : i32
    %c0_i32_1 = arith.constant 0 : i32
    return %c0_i32, %c0_i32_0 : i32, i32
  }
  func.func @transform_8(%arg0: i32) -> (i32, i32) {
    %c0_i32 = arith.constant 0 : i32
    %c0_i32_0 = arith.constant 0 : i32
    %c0_i32_1 = arith.constant 0 : i32
    return %c0_i32, %c0_i32_0 : i32, i32
  }
  func.func @transform_9(%arg0: i32) -> (i32, i32) {
    %c0_i32 = arith.constant 0 : i32
    %c0_i32_0 = arith.constant 0 : i32
    %c0_i32_1 = arith.constant 0 : i32
    return %c0_i32, %c0_i32_0 : i32, i32
  }
  func.func @transform_10(%arg0: i32) -> (i32, i32, i32) {
    %c0_i32 = arith.constant 0 : i32
    %c0_i32_0 = arith.constant 0 : i32
    %c0_i32_1 = arith.constant 0 : i32
    return %arg0, %c0_i32, %c0_i32_0 : i32, i32, i32
  }
}

</mosaic_0001>

<bundles_post_ra>
// kernel: tpu_custom_call.1
= control target key start
LH: loop header
LB: loop body
LE: loop exit
PB: predicated region body
PF: predicated region fallthrough
CT: control target
= control target key end

     0   :  { %15 = vsyncpa [#allocation4], 0  ;;  %s3547_s0 = inlined_call_operand.vmem [shape: f32[2,4,512], index: 0, kind: input, shape index: {}]   ;;  %s3548_s1 = inlined_call_operand.vmem [shape: f32[1,384], index: 1, kind: input, shape index: {}]   ;;  %s3549_s2 = inlined_call_operand.vmem [shape: bf16[9,4,4], index: 2, kind: input, shape index: {}]   ;;  %s3550_s3 = inlined_call_operand.vmem [shape: f32[4,1], index: 3, kind: input, shape index: {}]   ;;  %s3551_s4 = inlined_call_operand.vmem [shape: bf16[9,4,8], index: 4, kind: input, shape index: {}]   ;;  %s3552_s5 = inlined_call_operand.vmem [shape: f32[4,1], index: 5, kind: input, shape index: {}]   ;;  %s3553_s6 = inlined_call_operand.vmem [shape: bf16[9,4,12], index: 6, kind: input, shape index: {}]   ;;  %s3554_s7 = inlined_call_operand.vmem [shape: f32[4,1], index: 7, kind: input, shape index: {}]   ;;  %s3555_s8 = inlined_call_operand.vmem [shape: bf16[4,16], index: 8, kind: input, shape index: {}]   ;;  %s3556_s9 = inlined_call_operand.vmem [shape: f32[4,1], index: 9, kind: input, shape index: {}]   ;;  %s3557_s10 = inlined_call_operand.hbm [shape: f32[2,4,384], index: 10, kind: output, shape index: {}]  }
   0x1   :  { %17 = vsyncpa [#allocation4 + $0x1], 0  ;;  %s2927_s13 = smov 0   ;;  %s2929_s14 = smov 0  }
   0x2   :  { %s2931_s15 = smov 0   ;;  %s2933_s16 = smov 0  }
   0x3 LB: > { %s2948_s17 = sadd.s32 4294967295, %s2859_s16   ;;  %s2569_s18 = sadd.s32 4294967294, %s2859_s16   ;;  %s2859_s16 = sphi %s2933_s16, %s3615_s16   ;;  %s2855_s15 = sphi %s2931_s15, %s3614_s15   ;;  %s2851_s14 = sphi %s2929_s14, %s3613_s14   ;;  %s2847_s13 = sphi %s2927_s13, %s3612_s13  }
   0x4   : > { %s2952_s19 = sadd.s32 1, %s2859_s16   ;;  %s245_s20 = sadd.s32 1, %s2855_s15 }
   0x5   : > { %s242_s21 = ssub.s32 %s2859_s16, %s2952_s19  ;;  %p255_p0 = scmp.ne.s32.totalorder %s2855_s15, %s2851_s14 }
   0x6   : > { %p243_p1 = scmp.eq.s32.totalorder %s242_s21, 0  ;;  %p256_p2 = scmp.eq.s32.totalorder %s2948_s17, 1 }
   0x7   : > { %p261_p3 = scmp.ne.s32.totalorder %s2851_s14, %s2847_s13  ;;  %p262_p4 = scmp.eq.s32.totalorder %s2569_s18, 1 }
   0x8   : > { %s2963_s22 = scalar_select %p243_p1, %s2855_s15, %s245_s20  }
   0x9   : > { %p2965_p5 = por %p256_p2, %p255_p0  ;;  %p2969_p6 = por %p262_p4, %p261_p3 }
   0xa   : > { %p2572_p7 = scmp.ge.s32.totalorder %s2859_s16, 1  ;;  %p315_p8 = scmp.lt.s32.totalorder %s2859_s16, 3 }
   0xc   : > { %p316_p9 = pnand %p2572_p7, %p315_p8 }
   0xd   : > { %p353_p10 = scmp.lt.s32.totalorder (!%p316_p9), %s2948_s17, 1  ;;  %s2861_s30 = smov (!%p316_p9), 126  }
   0xe   : > { %319 = sbr.rel (%p316_p9) target bundleno = 1964 (0x7ac), region = 60  ;;  %s2862_s11 = smov (!%p316_p9), 127  }
   0xf   : > { %s2863_s12 = smov (!%p316_p9), 110   ;;  %s3570_s18 = smov (!%p316_p9), 109  }
  0x10   : > { %s3566_s20 = smov (!%p316_p9), 108   ;;  %s3568_s21 = smov (!%p316_p9), 92  }
  0x11   : > { %s3560_s27 = smov (!%p316_p9), 91   ;;  %s3558_s28 = smov (!%p316_p9), 90  }
  0x13   : > { %s354_s25 = scalar_select %p353_p10, %s2948_s17, 1  ;;  %vm3562_vm0 = vcmask 1041408   ;;  %v396_v26 = vld [vmem:[%s3549_s2] sm:$0x3]  ;;  %vm405_vm1 = vcmask 31744   ;;  %vm483_vm2 = vcmask 1039360  }
  0x14   : > { %v2578_v34 = vld [vmem:[%s3549_s2 + $0x2] sm:$0x3]  ;;  %v2869_v39 = vmov 0   ;;  %vm551_vm3 = vcmask 1031168   ;;  %v2582_v50 = vld [vmem:[%s3549_s2 + $0x4] sm:$0x3] }
  0x15   : > { %s2730_s26 = sshll.u32 %s354_s25, 4  ;;  %2794 = vset.pattern.permute.xlu2 %v2869_v39  ;;  %2795 = vset.pattern.permute.xlu1 %v2869_v39  ;;  %v388_v45 = vld [vmem:[%s3550_s3] sm:$0xf]  ;;  %vm619_vm4 = vcmask 900096   ;;  %vm687_vm5 = vcmask 891904   ;;  %vm3572_vm6 = vcmask 883712  }
  0x16   : > { %s2980_s29 = scalar_lea.vmem %s3547_s0, %s2730_s26  ;;  %2796 = vset.pattern.permute.xlu0 %v2869_v39  ;;  %vm3565_vm7 = vcmask 752640   ;;  %vm3564_vm8 = vcmask 744448   ;;  %vm3563_vm9 = vcmask 736256   ;;  %vm380_vm10 = vcmask 150530   ;;  %s2870_s25 = smov 19  }
  0x17   : > { %v361_v0 = vld [vmem:[%s2980_s29] sm:$0xff]  ;;  %v362_v1 = vld [vmem:[%s2980_s29 + $0x8] sm:$0xff]  ;;  %381 = vst.msk [vmem:[#allocation2] sm:$0xc] %vm380_vm10, %v2869_v39  ;;  %vm384_vm11 = vcmask 1043610   ;;  %vm1042_vm10 = vcmask 154624  }
  0x18   : > { %365 = vst [vmem:[#allocation1] ss:$2 sm:$0xff] %v361_v0  ;;  %s3585_s26 = smov 91  }
  0x19   : > { %367 = vst [vmem:[#allocation1 + $0x10] ss:$2 sm:$0xff] %v362_v1 }
  0x1a   : > { %385 = vst.msk [vmem:[#allocation2 + $0xc] sm:$0xc] %vm384_vm11, %v2869_v39 }
  0x1f   : > { %v368_v2 = vld.sshfl [vmem:[#allocation1] sm:$0xff pattern:$0x75316420]  ;;  %v369_v3 = vld.sshfl [vmem:[#allocation1 + $0x8] sm:$0xff pattern:$0x75316420] }
  0x20   : > { %v376_v4 = vpack.c.bf16 %v369_v3, %v368_v2  ;;  %v370_v5 = vld.sshfl [vmem:[#allocation1 + $0x10] sm:$0xff pattern:$0x75316420]  ;;  %v371_v6 = vld.sshfl [vmem:[#allocation1 + $0x18] sm:$0xff pattern:$0x75316420] }
  0x21   : > { %v377_v7 = vpack.c.bf16 %v371_v6, %v370_v5  ;;  %v2586_v2 = vld [vmem:[%s3549_s2 + $0x6] sm:$0x3] }
  0x22   : > { %378 = vst [vmem:[#allocation2] sm:$0x33] %v376_v4 }
  0x23   : > { %379 = vst [vmem:[#allocation2 + $0x8] sm:$0x33] %v377_v7 }
  0x29   : > { %v461_v8 = vld [vmem:[#allocation2] sm:$0x33] }
  0x2a   : > { %v467_v9 = vunpack.c.l.b16 %v461_v8  ;;  %v462_v10 = vld [vmem:[#allocation2 + $0x8] sm:$0x33]  ;;  %v468_v14 = vunpack.c.h.b16 %v461_v8  ;;  %v394_v18 = vld [vmem:[#allocation2] sm:$0x33] }
  0x2b   : > { %v469_v11 = vunpack.c.l.b16 %v462_v10  ;;  %v470_v15 = vunpack.c.h.b16 %v462_v10  ;;  %v395_v19 = vld [vmem:[#allocation2 + $0x8] sm:$0x3]  ;;  %v400_v20 = vunpack.c.h.b16 %v394_v18  ;;  %v399_v27 = vunpack.c.l.b16 %v394_v18 }
  0x2c   : > { %v2984_v12 = vpack.c.b16 %v467_v9, %v467_v9  ;;  %v472_v16 = vpack.c.b16 %v468_v14, %v468_v14  ;;  %v401_v21 = vunpack.c.l.b16 %v395_v19  ;;  %v2590_v19 = vld [vmem:[%s3549_s2 + $0x8] sm:$0x3] }
  0x2d   : > { %v473_v13 = vpack.c.b16 %v469_v11, %v469_v11  ;;  %v474_v17 = vpack.c.b16 %v470_v15, %v470_v15  ;;  %v403_v22 = vpack.c.b16 %v400_v20, %v400_v20  ;;  %v402_v28 = vpack.c.b16 %v399_v27, %v399_v27 }
  0x2e   : > { %543 = vrot.lane.b32.xlu1 %v2984_v12, %s2861_s30  ;;  %475 = vrot.lane.b32.xlu0 %v2984_v12, %s2862_s11  ;;  %v404_v23 = vpack.c.b16 %v401_v21, %v401_v21 }
  0x2f   : > { %479 = vrot.lane.b32.xlu2 %v473_v13, %s2862_s11  ;;  %v414_v24 = vsel %vm3562_vm0, %v403_v22, 0  ;;  %v411_v29 = vsel %vm3562_vm0, %v402_v28, 0 }
  0x30   : > { %v417_v25 = vsel %vm3562_vm0, %v404_v23, 0  ;;  %439 = vmatpush.bf16.msra.mxu1 %v414_v24  ;;  %426 = vmatpush.bf16.msra.mxu0 %v411_v29 }
  0x31   : > { %452 = vmatpush.bf16.msra.mxu2 %v417_v25 }
  0x33   : > { %2576 = vmatmul.msk.bf16.vlgmr.msra.gmra.mxu1 %vm405_vm1, %v396_v26  ;;  %2575 = vmatmul.msk.bf16.vlgmr.msra.gmra.mxu0 %vm405_vm1, %v396_v26 }
  0x34   : > { %2577 = vmatmul.msk.bf16.vlgmr.msra.gmra.mxu2 %vm405_vm1, %v396_v26 }
  0x36   : > { %545 = vrot.lane.b32.xlu1 %v472_v16, %s2861_s30  ;;  %477 = vrot.lane.b32.xlu0 %v472_v16, %s2862_s11 }
  0x37   : > { %481 = vrot.lane.b32.xlu2 %v474_v17, %s2862_s11 }
  0x3e   : > { %613 = vrot.lane.b32.xlu1 %v472_v16, %s2863_s12  ;;  %547 = vrot.lane.b32.xlu0 %v473_v13, %s2861_s30 }
  0x3f   : > { %615 = vrot.lane.b32.xlu2 %v473_v13, %s2863_s12 }
  0x46   : > { %611 = vrot.lane.b32.xlu1 %v2984_v12, %s2863_s12  ;;  %549 = vrot.lane.b32.xlu0 %v474_v17, %s2861_s30 }
  0x47   : > { %617 = vrot.lane.b32.xlu2 %v474_v17, %s2863_s12 }
  0x4e   : > { %683 = vrot.lane.b32.xlu0 %v473_v13, %s3570_s18  ;;  %685 = vrot.lane.b32.xlu1 %v474_v17, %s3570_s18 }
  0x4f   : > { %679 = vrot.lane.b32.xlu2 %v2984_v12, %s3570_s18 }
  0x56   : > { %681 = vrot.lane.b32.xlu0 %v472_v16, %s3570_s18  ;;  %747 = vrot.lane.b32.xlu1 %v2984_v12, %s3566_s20 }
  0x57   : > { %749 = vrot.lane.b32.xlu2 %v472_v16, %s3566_s20 }
  0x5e   : > { %815 = vrot.lane.b32.xlu0 %v2984_v12, %s3568_s21  ;;  %817 = vrot.lane.b32.xlu1 %v472_v16, %s3568_s21 }
  0x5f   : > { %751 = vrot.lane.b32.xlu2 %v473_v13, %s3566_s20 }
  0x66   : > { %753 = vrot.lane.b32.xlu0 %v474_v17, %s3566_s20  ;;  %819 = vrot.lane.b32.xlu1 %v473_v13, %s3568_s21 }
  0x67   : > { %885 = vrot.lane.b32.xlu2 %v472_v16, %s3560_s27 }
  0x6e   : > { %887 = vrot.lane.b32.xlu0 %v473_v13, %s3560_s27  ;;  %821 = vrot.lane.b32.xlu1 %v474_v17, %s3568_s21 }
  0x6f   : > { %883 = vrot.lane.b32.xlu2 %v2984_v12, %s3560_s27 }
  0x76   : > { %889 = vrot.lane.b32.xlu0 %v474_v17, %s3560_s27  ;;  %955 = vrot.lane.b32.xlu1 %v473_v13, %s3558_s28  ;;  %s3586_s27 = smov 90  }
  0x77   : > { %957 = vrot.lane.b32.xlu2 %v474_v17, %s3558_s28 }
  0x7e   : > { %953 = vrot.lane.b32.xlu1 %v472_v16, %s3558_s28  ;;  %951 = vrot.lane.b32.xlu0 %v2984_v12, %s3558_s28  ;;  %s2743_s28 = smul.u32 12, %s2948_s17 }
  0x7f   : > { %391 = vperm.xlu2 %2794, %v388_v45  }
  0x89   : > { %v480_v30 = vpop.permute.xlu2 %479 }
  0x91   : > { %v482_v31 = vpop.permute.xlu2 %481 }
  0x92   : > { %v486_v32 = vsel %vm483_vm2, %v480_v30, %v482_v31 }
  0x93   : > { %v497_v33 = vsel %vm3562_vm0, %v486_v32, 0 }
  0x94   : > { %532 = vmatpush.bf16.msrb.mxu1 %v497_v33  ;;  %v2594_v33 = vld [vmem:[%s3549_s2 + $0xa] sm:$0x3] }
  0x97   : > { %2581 = vmatmul.msk.bf16.vlgmr.msrb.gmra.mxu1 %vm405_vm1, %v2578_v34 }
  0x99   : > { %v616_v35 = vpop.permute.xlu2 %615 }
  0xa0   : > { %v544_v36 = vpop.permute.xlu1 %543  ;;  %v476_v37 = vpop.permute.xlu0 %475 }
  0xa1   : > { %v618_v38 = vpop.permute.xlu2 %617 }
  0xa2   : > { %v622_v51 = vsel %vm619_vm4, %v616_v35, %v618_v38 }
  0xa3   : > { %v633_v56 = vsel %vm3562_vm0, %v622_v51, 0  ;;  %v2602_v51 = vld [vmem:[%s3549_s2 + $0xe] sm:$0x3] }
  0xa8   : > { %v546_v40 = vpop.permute.xlu1 %545  ;;  %v478_v41 = vpop.permute.xlu0 %477 }
  0xa9   : > { %v484_v42 = vsel %vm483_vm2, %v476_v37, %v478_v41  ;;  %v485_v43 = vsel %vm483_vm2, %v478_v41, %v480_v30  ;;  %v552_v44 = vsel %vm551_vm3, %v544_v36, %v546_v40  ;;  %v680_v49 = vpop.permute.xlu2 %679 }
  0xaa   : > { %v491_v46 = vsel %vm3562_vm0, %v484_v42, 0  ;;  %v494_v47 = vsel %vm3562_vm0, %v485_v43, 0  ;;  %v559_v48 = vsel %vm3562_vm0, %v552_v44, 0 }
  0xab   : > { %506 = vmatpush.bf16.msra.mxu3 %v491_v46  ;;  %519 = vmatpush.bf16.msrb.mxu0 %v494_v47 }
  0xac   : > { %574 = vmatpush.bf16.msrb.mxu2 %v559_v48 }
  0xae   : > { %2579 = vmatmul.msk.bf16.vlgmr.msra.gmra.mxu3 %vm405_vm1, %v2578_v34  ;;  %2580 = vmatmul.msk.bf16.vlgmr.msrb.gmra.mxu0 %vm405_vm1, %v2578_v34  ;;  %v2598_v34 = vld [vmem:[%s3549_s2 + $0xc] sm:$0x3] }
  0xaf   : > { %2583 = vmatmul.msk.bf16.vlgmr.msrb.gmra.mxu2 %vm405_vm1, %v2582_v50 }
  0xb0   : > { %v614_v52 = vpop.permute.xlu1 %613  ;;  %v548_v53 = vpop.permute.xlu0 %547 }
  0xb1   : > { %v621_v54 = vsel %vm619_vm4, %v614_v52, %v616_v35  ;;  %v553_v55 = vsel %vm551_vm3, %v546_v40, %v548_v53  ;;  %v750_v59 = vpop.permute.xlu2 %749  ;;  %v441_v42 = vpop.f32.mrf.mxu1 }
  0xb2   : > { %v630_v57 = vsel %vm3562_vm0, %v621_v54, 0  ;;  %v562_v58 = vsel %vm3562_vm0, %v553_v55, 0 }
  0xb3   : > { %587 = vmatpush.bf16.msrb.mxu3 %v562_v58  ;;  %655 = vmatpush.bf16.msra.mxu2 %v630_v57 }
  0xb7   : > { %668 = vmatpush.bf16.msra.mxu3 %v633_v56 }
  0xb8   : > { %v612_v60 = vpop.permute.xlu1 %611  ;;  %v550_v61 = vpop.permute.xlu0 %549 }
  0xb9   : > { %v620_v62 = vsel %vm619_vm4, %v612_v60, %v614_v52  ;;  %v554_v63 = vsel %vm551_vm3, %v548_v53, %v550_v61  ;;  %v752_v3 = vpop.permute.xlu2 %751  ;;  %v443_v52 = vpop.f32.mrf.mxu1 }
  0xba   : > { %v627_v0 = vsel %vm3562_vm0, %v620_v62, 0  ;;  %v565_v1 = vsel %vm3562_vm0, %v554_v63, 0  ;;  %v757_v8 = vsel %vm3572_vm6, %v750_v59, %v752_v3  ;;  %v428_v53 = vpop.f32.mrf.mxu0  ;;  %v2606_v62 = vld [vmem:[%s3549_s2 + $0x10] sm:$0x3] }
  0xbb   : > { %600 = vmatpush.bf16.msra.mxu0 %v565_v1  ;;  %642 = vmatpush.bf16.msra.mxu1 %v627_v0  ;;  %v766_v14 = vsel %vm3562_vm0, %v757_v8, 0 }
  0xbe   : > { %2584 = vmatmul.msk.bf16.vlgmr.msrb.gmra.mxu3 %vm405_vm1, %v2582_v50  ;;  %2585 = vmatmul.msk.bf16.vlgmr.msra.gmra.mxu0 %vm405_vm1, %v2582_v50  ;;  %v454_v50 = vpop.f32.mrf.mxu2 }
  0xbf   : > { %2587 = vmatmul.msk.bf16.vlgmr.msra.gmra.mxu1 %vm405_vm1, %v2586_v2  ;;  %2588 = vmatmul.msk.bf16.vlgmr.msra.gmra.mxu2 %vm405_vm1, %v2586_v2 }
  0xc0   : > { %v684_v4 = vpop.permute.xlu0 %683  ;;  %v686_v5 = vpop.permute.xlu1 %685 }
  0xc1   : > { %v690_v6 = vsel %vm687_vm5, %v684_v4, %v686_v5  ;;  %v886_v15 = vpop.permute.xlu2 %885 }
  0xc2   : > { %v701_v7 = vsel %vm3562_vm0, %v690_v6, 0  ;;  %v430_v61 = vpop.f32.mrf.mxu0 }
  0xc3   : > { %736 = vmatpush.bf16.msrb.mxu2 %v701_v7 }
  0xc6   : > { %v456_v60 = vpop.f32.mrf.mxu2 }
  0xc8   : > { %v682_v9 = vpop.permute.xlu0 %681  ;;  %v748_v10 = vpop.permute.xlu1 %747 }
  0xc9   : > { %v688_v11 = vsel %vm687_vm5, %v680_v49, %v682_v9  ;;  %v689_v12 = vsel %vm687_vm5, %v682_v9, %v684_v4  ;;  %v756_v13 = vsel %vm3572_vm6, %v748_v10, %v750_v59  ;;  %v884_v24 = vpop.permute.xlu2 %883 }
  0xca   : > { %v695_v16 = vsel %vm3562_vm0, %v688_v11, 0  ;;  %v698_v17 = vsel %vm3562_vm0, %v689_v12, 0  ;;  %v763_v18 = vsel %vm3562_vm0, %v756_v13, 0  ;;  %v892_v25 = vsel %vm3564_vm8, %v884_v24, %v886_v15 }
  0xcb   : > { %710 = vmatpush.bf16.msrb.mxu0 %v695_v16  ;;  %723 = vmatpush.bf16.msrb.mxu1 %v698_v17  ;;  %v899_v30 = vsel %vm3562_vm0, %v892_v25, 0 }
  0xcc   : > { %778 = vmatpush.bf16.msrb.mxu3 %v763_v18 }
  0xce   : > { %2589 = vmatmul.msk.bf16.vlgmr.msra.gmra.mxu3 %vm405_vm1, %v2586_v2  ;;  %2591 = vmatmul.msk.bf16.vlgmr.msrb.gmra.mxu0 %vm405_vm1, %v2590_v19 }
  0xcf   : > { %791 = vmatpush.bf16.msra.mxu0 %v766_v14  ;;  %2592 = vmatmul.msk.bf16.vlgmr.msrb.gmra.mxu1 %vm405_vm1, %v2590_v19 }
  0xd0   : > { %2593 = vmatmul.msk.bf16.vlgmr.msrb.gmra.mxu2 %vm405_vm1, %v2590_v19  ;;  %v816_v20 = vpop.permute.xlu0 %815  ;;  %v818_v21 = vpop.permute.xlu1 %817 }
  0xd1   : > { %v824_v22 = vsel %vm3565_vm7, %v816_v20, %v818_v21  ;;  %v958_v43 = vpop.permute.xlu2 %957 }
  0xd2   : > { %v831_v23 = vsel %vm3562_vm0, %v824_v22, 0 }
  0xd3   : > { %846 = vmatpush.bf16.msra.mxu2 %v831_v23 }
  0xd8   : > { %v754_v26 = vpop.permute.xlu0 %753  ;;  %v820_v27 = vpop.permute.xlu1 %819 }
  0xd9   : > { %v758_v28 = vsel %vm3572_vm6, %v752_v3, %v754_v26  ;;  %v825_v29 = vsel %vm3565_vm7, %v818_v21, %v820_v27  ;;  %v392_v63 = vpop.permute.xlu2 %391 }
  0xda   : > { %v769_v31 = vsel %vm3562_vm0, %v758_v28, 0  ;;  %v834_v32 = vsel %vm3562_vm0, %v825_v29, 0  ;;  %v460_v0 = vadd.f32 %v454_v50, %v392_v63  ;;  %v459_v4 = vadd.f32 %v441_v42, %v392_v63 }
  0xdb   : > { %804 = vmatpush.bf16.msra.mxu1 %v769_v31  ;;  %859 = vmatpush.bf16.msra.mxu3 %v834_v32 }
  0xde   : > { %2595 = vmatmul.msk.bf16.vlgmr.msrb.gmra.mxu3 %vm405_vm1, %v2594_v33  ;;  %2596 = vmatmul.msk.bf16.vlgmr.msra.gmra.mxu0 %vm405_vm1, %v2594_v33 }
  0xdf   : > { %914 = vmatpush.bf16.msrb.mxu1 %v899_v30 }
  0xe0   : > { %2597 = vmatmul.msk.bf16.vlgmr.msra.gmra.mxu1 %vm405_vm1, %v2594_v33  ;;  %2599 = vmatmul.msk.bf16.vlgmr.msra.gmra.mxu2 %vm405_vm1, %v2598_v34  ;;  %v888_v35 = vpop.permute.xlu0 %887  ;;  %v822_v36 = vpop.permute.xlu1 %821 }
  0xe1   : > { %v893_v37 = vsel %vm3564_vm8, %v886_v15, %v888_v35  ;;  %v826_v38 = vsel %vm3565_vm7, %v820_v27, %v822_v36 }
  0xe2   : > { %v902_v40 = vsel %vm3562_vm0, %v893_v37, 0  ;;  %v837_v41 = vsel %vm3562_vm0, %v826_v38, 0 }
  0xe3   : > { %872 = vmatpush.bf16.msrb.mxu0 %v837_v41  ;;  %927 = vmatpush.bf16.msrb.mxu2 %v902_v40 }
  0xe8   : > { %v890_v44 = vpop.permute.xlu0 %889  ;;  %v956_v45 = vpop.permute.xlu1 %955 }
  0xe9   : > { %v894_v46 = vsel %vm3564_vm8, %v888_v35, %v890_v44  ;;  %v962_v47 = vsel %vm3563_vm9, %v956_v45, %v958_v43  ;;  %v359_v44 = vld [vmem:[%s3548_s1] sm:$0x7]  ;;  %vm1044_vm8 = vcmask 1043456  }
  0xea   : > { %v905_v48 = vsel %vm3562_vm0, %v894_v46, 0  ;;  %v973_v49 = vsel %vm3562_vm0, %v962_v47, 0  ;;  %vm360_vm12 = vcmp.gt.f32.partialorder %v359_v44, 0.5 }
  0xeb   : > { %940 = vmatpush.bf16.msrb.mxu3 %v905_v48  ;;  %1008 = vmatpush.bf16.msra.mxu2 %v973_v49 }
  0xee   : > { %2600 = vmatmul.msk.bf16.vlgmr.msra.gmra.mxu3 %vm405_vm1, %v2598_v34  ;;  %2601 = vmatmul.msk.bf16.vlgmr.msrb.gmra.mxu0 %vm405_vm1, %v2598_v34  ;;  %v458_v34 = vadd.f32 %v428_v53, %v392_v63 }
  0xf0   : > { %2603 = vmatmul.msk.bf16.vlgmr.msrb.gmra.mxu1 %vm405_vm1, %v2602_v51  ;;  %2604 = vmatmul.msk.bf16.vlgmr.msrb.gmra.mxu2 %vm405_vm1, %v2602_v51  ;;  %v954_v54 = vpop.permute.xlu1 %953  ;;  %v952_v55 = vpop.permute.xlu0 %951 }
  0xf1   : > { %v961_v56 = vsel %vm3563_vm9, %v954_v54, %v956_v45  ;;  %v960_v57 = vsel %vm3563_vm9, %v952_v55, %v954_v54  ;;  %v1020_v55 = vsel %vm360_vm12, 1, %v2869_v39  ;;  %vm1053_vm9 = vcmask 154630  }
  0xf2   : > { %v970_v58 = vsel %vm3562_vm0, %v961_v56, 0  ;;  %v967_v59 = vsel %vm3562_vm0, %v960_v57, 0  ;;  %v1021_v60 = vperm.slane %v1020_v55, 0  ;;  %v1022_v63 = vperm.slane %v1020_v55, 1 }
  0xf3   : > { %982 = vmatpush.bf16.msra.mxu0 %v967_v59  ;;  %995 = vmatpush.bf16.msra.mxu1 %v970_v58  ;;  %vm1052_vm0 = vcmask 1043458  }
  0xf4   : > { %vm3144_vm13 = vcmp.eq.s32.totalorder %v1021_v60, 1  ;;  %vm3148_vm14 = vcmp.eq.s32.totalorder %v1022_v63, 1  ;;  %vm3172_vm7 = vmor %vm1053_vm9, %vm1052_vm0  ;;  %vm1073_vm0 = vcmask 64512   ;;  %vm3587_vm9 = vcmask 752640  }
  0xfe   : > { %2605 = vmatmul.msk.bf16.vlgmr.msrb.gmra.mxu3 %vm405_vm1, %v2602_v51  ;;  %2607 = vmatmul.msk.bf16.vlgmr.msra.gmra.mxu0 %vm405_vm1, %v2606_v62 }
 0x100   : > { %2608 = vmatmul.msk.bf16.vlgmr.msra.gmra.mxu1 %vm405_vm1, %v2606_v62  ;;  %2609 = vmatmul.msk.bf16.vlgmr.msra.gmra.mxu2 %vm405_vm1, %v2606_v62  ;;  %vm1049_vm1 = vcmask 1047558  }
 0x101   : > { %vm3165_vm12 = vmor %vm1049_vm1, %vm384_vm11  ;;  %vm3589_vm1 = vcmask 744448  }
 0x102   : > { %vm3588_vm11 = vmmov %vm3587_vm9 }
 0x114   : > { %v534_v1 = vpop.f32.mrf.mxu1 }
 0x115   : > { %v540_v2 = vadd.f32 %v534_v1, %v460_v0 }
 0x11c   : > { %v536_v3 = vpop.f32.mrf.mxu1 }
 0x12b   : > { %v521_v5 = vpop.f32.mrf.mxu0 }
 0x12c   : > { %v539_v6 = vadd.f32 %v521_v5, %v459_v4 }
 0x131   : > { %v508_v7 = vpop.f32.mrf.mxu3 }
 0x132   : > { %v576_v8 = vpop.f32.mrf.mxu2  ;;  %v538_v36 = vadd.f32 %v508_v7, %v458_v34 }
 0x133   : > { %v523_v9 = vpop.f32.mrf.mxu0 }
 0x134   : > { %v606_v42 = vadd.f32 %v576_v8, %v538_v36  ;;  %v2372_v36 = vld [vmem:[%s3556_s9] sm:$0xf] }
 0x139   : > { %v510_v10 = vpop.f32.mrf.mxu3 }
 0x13a   : > { %v578_v11 = vpop.f32.mrf.mxu2 }
 0x13b   : > { %v602_v12 = vpop.f32.mrf.mxu0 }
 0x13c   : > { %v644_v13 = vpop.f32.mrf.mxu1  ;;  %v608_v54 = vadd.f32 %v602_v12, %v540_v2 }
 0x13d   : > { %v674_v43 = vadd.f32 %v644_v13, %v606_v42 }
 0x141   : > { %v589_v14 = vpop.f32.mrf.mxu3 }
 0x142   : > { %v657_v15 = vpop.f32.mrf.mxu2  ;;  %v607_v41 = vadd.f32 %v589_v14, %v539_v6 }
 0x143   : > { %v604_v16 = vpop.f32.mrf.mxu0 }
 0x144   : > { %v646_v17 = vpop.f32.mrf.mxu1  ;;  %v675_v45 = vadd.f32 %v657_v15, %v607_v41  ;;  %v1023_v15 = vperm.slane %v1020_v55, 2 }
 0x146   : > { %vm3156_vm15 = vcmp.eq.s32.totalorder %v1023_v15, 1 }
 0x149   : > { %v591_v18 = vpop.f32.mrf.mxu3 }
 0x14a   : > { %v659_v19 = vpop.f32.mrf.mxu2 }
 0x14b   : > { %v712_v20 = vpop.f32.mrf.mxu0 }
 0x14c   : > { %v725_v21 = vpop.f32.mrf.mxu1  ;;  %v742_v47 = vadd.f32 %v712_v20, %v674_v43 }
 0x14d   : > { %v743_v49 = vadd.f32 %v725_v21, %v675_v45 }
 0x151   : > { %v670_v22 = vpop.f32.mrf.mxu3 }
 0x152   : > { %v676_v57 = vadd.f32 %v670_v22, %v608_v54 }
 0x153   : > { %v738_v23 = vpop.f32.mrf.mxu2  ;;  %v714_v24 = vpop.f32.mrf.mxu0 }
 0x154   : > { %v727_v25 = vpop.f32.mrf.mxu1  ;;  %v744_v3 = vadd.f32 %v738_v23, %v676_v57 }
 0x159   : > { %v672_v26 = vpop.f32.mrf.mxu3 }
 0x15b   : > { %v740_v27 = vpop.f32.mrf.mxu2  ;;  %v793_v28 = vpop.f32.mrf.mxu0 }
 0x15c   : > { %v811_v53 = vadd.f32 %v793_v28, %v743_v49 }
 0x15d   : > { %v806_v29 = vpop.f32.mrf.mxu1 }
 0x15e   : > { %v812_v7 = vadd.f32 %v806_v29, %v744_v3 }
 0x161   : > { %v780_v30 = vpop.f32.mrf.mxu3 }
 0x162   : > { %v810_v51 = vadd.f32 %v780_v30, %v742_v47 }
 0x163   : > { %v848_v31 = vpop.f32.mrf.mxu2  ;;  %v795_v32 = vpop.f32.mrf.mxu0 }
 0x164   : > { %v878_v58 = vadd.f32 %v848_v31, %v810_v51 }
 0x165   : > { %v808_v33 = vpop.f32.mrf.mxu1 }
 0x169   : > { %v782_v35 = vpop.f32.mrf.mxu3 }
 0x16b   : > { %v850_v37 = vpop.f32.mrf.mxu2  ;;  %v874_v38 = vpop.f32.mrf.mxu0 }
 0x16c   : > { %v880_v11 = vadd.f32 %v874_v38, %v812_v7 }
 0x16d   : > { %v916_v40 = vpop.f32.mrf.mxu1 }
 0x16e   : > { %v946_v61 = vadd.f32 %v916_v40, %v878_v58  ;;  %v1056_v58 = vld [vmem:[%s3552_s5] sm:$0xf] }
 0x171   : > { %v861_v46 = vpop.f32.mrf.mxu3 }
 0x172   : > { %v879_v56 = vadd.f32 %v861_v46, %v811_v53 }
 0x173   : > { %v929_v48 = vpop.f32.mrf.mxu2  ;;  %v876_v50 = vpop.f32.mrf.mxu0 }
 0x174   : > { %v947_v0 = vadd.f32 %v929_v48, %v879_v56  ;;  %v1064_v56 = vld [vmem:[%s3551_s4] sm:$0x3] }
 0x175   : > { %v918_v52 = vpop.f32.mrf.mxu1 }
 0x179   : > { %v863_v59 = vpop.f32.mrf.mxu3 }
 0x17b   : > { %v931_v62 = vpop.f32.mrf.mxu2  ;;  %v984_v1 = vpop.f32.mrf.mxu0 }
 0x17c   : > { %v1014_v4 = vadd.f32 %v984_v1, %v946_v61 }
 0x17d   : > { %v997_v5 = vpop.f32.mrf.mxu1 }
 0x17e   : > { %v1015_v2 = vadd.f32 %v997_v5, %v947_v0  ;;  %v1017_v8 = vmax.f32 %v1014_v4, 0.0  ;;  %v2613_v0 = vld [vmem:[%s3551_s4 + $0x2] sm:$0x3] }
 0x180   : > { %v1018_v10 = vmax.f32 %v1015_v2, 0.0  ;;  %v1027_v12 = vsel %vm3144_vm13, %v1017_v8, 0.0 }
 0x181   : > { %v942_v14 = vpop.f32.mrf.mxu3 }
 0x182   : > { %v1028_v13 = vsel %vm3148_vm14, %v1018_v10, 0.0  ;;  %v948_v17 = vadd.f32 %v942_v14, %v880_v11 }
 0x183   : > { %v1030_v16 = vpack.c.bf16 %v1028_v13, %v1027_v12  ;;  %v1010_v18 = vpop.f32.mrf.mxu2  ;;  %v986_v19 = vpop.f32.mrf.mxu0 }
 0x184   : > { %v1016_v20 = vadd.f32 %v1010_v18, %v948_v17  ;;  %v2617_v19 = vld [vmem:[%s3551_s4 + $0x4] sm:$0x3] }
 0x185   : > { %v999_v21 = vpop.f32.mrf.mxu1  ;;  %v1034_v22 = vrot.slane %v1030_v16, 6 }
 0x186   : > { %v1019_v24 = vmax.f32 %v1016_v20, 0.0 }
 0x187   : > { %1036 = vrot.lane.b32.xlu0 %v1034_v22, %s2870_s25 }
 0x188   : > { %v1029_v25 = vsel %vm3156_vm15, %v1019_v24, 0.0 }
 0x189   : > { %v1031_v26 = vpack.c.bf16 %v1029_v25, %v1029_v25  ;;  %v944_v27 = vpop.f32.mrf.mxu3 }
 0x18a   : > { %v2621_v27 = vld [vmem:[%s3551_s4 + $0x6] sm:$0x3] }
 0x18b   : > { %v1012_v28 = vpop.f32.mrf.mxu2  ;;  %v1035_v29 = vrot.slane %v1031_v26, 6 }
 0x18d   : > { %1038 = vrot.lane.b32.xlu1 %v1035_v29, %s2870_s25 }
 0x1f9   : > { %v1037_v30 = vpop.permute.xlu0 %1036 }
 0x1fa   : > { %v1040_v32 = vrot.slane %v1037_v30, 4 }
 0x1fc   : > { %v1043_v33 = vsel %vm1042_vm10, %v1040_v32, %v1037_v30 }
 0x1fd   : > { %1051 = vst.msk [vmem:[#allocation2] sm:$0xcc] %vm3165_vm12, %v1043_v33 }
 0x1ff   : > { %v1039_v34 = vpop.permute.xlu1 %1038 }
 0x200   : > { %v1041_v35 = vrot.slane %v1039_v34, 4 }
 0x202   : > { %v1045_v37 = vsel %vm1044_vm8, %v1040_v32, %v1041_v35 }
 0x203   : > { %v1046_v38 = vsel %vm1042_vm10, %v1045_v37, %v1039_v34 }
 0x204   : > { %v1129_v40 = vld [vmem:[#allocation2] sm:$0xff]  ;;  %1055 = vst.msk [vmem:[#allocation2 + $0x8] sm:$0xcc] %vm3172_vm7, %v1046_v38 }
 0x205   : > { %v1136_v41 = vunpack.c.h.b16 %v1129_v40  ;;  %v1135_v42 = vunpack.c.l.b16 %v1129_v40 }
 0x207   : > { %v1140_v43 = vpack.c.b16 %v1136_v41, %v1136_v41  ;;  %v1139_v44 = vpack.c.b16 %v1135_v42, %v1135_v42 }
 0x209   : > { %1145 = vrot.lane.b32.xlu0 %v1140_v43, %s2862_s11  ;;  %1143 = vrot.lane.b32.xlu2 %v1139_v44, %s2862_s11  ;;  %v1079_v45 = vsel %vm1044_vm8, %v1139_v44, 0  ;;  %v1082_v46 = vsel %vm1044_vm8, %v1140_v43, 0 }
 0x20a   : > { %1094 = vmatpush.bf16.msra.mxu3 %v1079_v45  ;;  %1107 = vmatpush.bf16.msrb.mxu0 %v1082_v46  ;;  %v2625_v45 = vld [vmem:[%s3551_s4 + $0x8] sm:$0x3] }
 0x20b   : > { %v1130_v47 = vld [vmem:[#allocation2 + $0x8] sm:$0xff] }
 0x20c   : > { %v1063_v48 = vld [vmem:[#allocation2 + $0x8] sm:$0xf]  ;;  %v1137_v49 = vunpack.c.l.b16 %v1130_v47  ;;  %v1138_v50 = vunpack.c.h.b16 %v1130_v47 }
 0x20d   : > { %v1069_v51 = vunpack.c.l.b16 %v1063_v48  ;;  %2610 = vmatmul.msk.bf16.vlgmr.msra.gmra.mxu3 %vm1073_vm0, %v1064_v56  ;;  %2611 = vmatmul.msk.bf16.vlgmr.msrb.gmra.mxu0 %vm1073_vm0, %v1064_v56 }
 0x20e   : > { %v1141_v52 = vpack.c.b16 %v1137_v49, %v1137_v49  ;;  %v1142_v53 = vpack.c.b16 %v1138_v50, %v1138_v50 }
 0x20f   : > { %v1072_v54 = vpack.c.b16 %v1069_v51, %v1069_v51 }
 0x210   : > { %1147 = vrot.lane.b32.xlu1 %v1141_v52, %s2862_s11 }
 0x211   : > { %1210 = vrot.lane.b32.xlu0 %v1139_v44, %s2861_s30  ;;  %v1085_v55 = vsel %vm1044_vm8, %v1072_v54, 0  ;;  %1149 = vrot.lane.b32.xlu2 %v1142_v53, %s2862_s11 }
 0x212   : > { %1120 = vmatpush.bf16.msrb.mxu1 %v1085_v55  ;;  %v2629_v55 = vld [vmem:[%s3551_s4 + $0xa] sm:$0x3] }
 0x215   : > { %2612 = vmatmul.msk.bf16.vlgmr.msrb.gmra.mxu1 %vm1073_vm0, %v1064_v56 }
 0x218   : > { %1212 = vrot.lane.b32.xlu1 %v1140_v43, %s2861_s30 }
 0x219   : > { %1216 = vrot.lane.b32.xlu0 %v1142_v53, %s2861_s30  ;;  %1214 = vrot.lane.b32.xlu2 %v1141_v52, %s2861_s30 }
 0x220   : > { %1277 = vrot.lane.b32.xlu1 %v1139_v44, %s2863_s12 }
 0x221   : > { %1281 = vrot.lane.b32.xlu0 %v1141_v52, %s2863_s12  ;;  %1279 = vrot.lane.b32.xlu2 %v1140_v43, %s2863_s12 }
 0x228   : > { %1283 = vrot.lane.b32.xlu1 %v1142_v53, %s2863_s12 }
 0x229   : > { %1346 = vrot.lane.b32.xlu0 %v1140_v43, %s3570_s18  ;;  %1344 = vrot.lane.b32.xlu2 %v1139_v44, %s3570_s18 }
 0x230   : > { %1348 = vrot.lane.b32.xlu1 %v1141_v52, %s3570_s18 }
 0x231   : > { %1411 = vrot.lane.b32.xlu0 %v1139_v44, %s3566_s20  ;;  %1350 = vrot.lane.b32.xlu2 %v1142_v53, %s3570_s18 }
 0x238   : > { %1413 = vrot.lane.b32.xlu1 %v1140_v43, %s3566_s20 }
 0x239   : > { %1417 = vrot.lane.b32.xlu0 %v1142_v53, %s3566_s20  ;;  %1415 = vrot.lane.b32.xlu2 %v1141_v52, %s3566_s20  ;;  %s3597_s20 = smov 109  }
 0x240   : > { %1478 = vrot.lane.b32.xlu1 %v1139_v44, %s3568_s21 }
 0x241   : > { %1482 = vrot.lane.b32.xlu0 %v1141_v52, %s3568_s21  ;;  %1480 = vrot.lane.b32.xlu2 %v1140_v43, %s3568_s21 }
 0x248   : > { %1484 = vrot.lane.b32.xlu1 %v1142_v53, %s3568_s21  ;;  %s2505_s21 = scalar_lea.hbm %s3557_s10, %s2743_s28 }
 0x249   : > { %1547 = vrot.lane.b32.xlu0 %v1140_v43, %s3585_s26  ;;  %1545 = vrot.lane.b32.xlu2 %v1139_v44, %s3585_s26 }
 0x250   : > { %1549 = vrot.lane.b32.xlu1 %v1141_v52, %s3585_s26 }
 0x251   : > { %1612 = vrot.lane.b32.xlu0 %v1139_v44, %s3586_s27  ;;  %1551 = vrot.lane.b32.xlu2 %v1142_v53, %s3585_s26 }
 0x258   : > { %1614 = vrot.lane.b32.xlu1 %v1140_v43, %s3586_s27 }
 0x259   : > { %1618 = vrot.lane.b32.xlu0 %v1142_v53, %s3586_s27  ;;  %1616 = vrot.lane.b32.xlu2 %v1141_v52, %s3586_s27 }
 0x260   : > { %1059 = vperm.xlu1 %2795, %v1056_v58  }
 0x263   : > { %v1144_v57 = vpop.permute.xlu2 %1143 }
 0x26b   : > { %v1150_v59 = vpop.permute.xlu2 %1149 }
 0x273   : > { %v1215_v60 = vpop.permute.xlu2 %1214 }
 0x27b   : > { %v1146_v61 = vpop.permute.xlu0 %1145  ;;  %v1280_v4 = vpop.permute.xlu2 %1279 }
 0x27c   : > { %v1151_v62 = vsel %vm483_vm2, %v1144_v57, %v1146_v61 }
 0x27d   : > { %v1158_v63 = vsel %vm1044_vm8, %v1151_v62, 0 }
 0x27e   : > { %1173 = vmatpush.bf16.msrb.mxu2 %v1158_v63 }
 0x281   : > { %2614 = vmatmul.msk.bf16.vlgmr.msrb.gmra.mxu2 %vm1073_vm0, %v2613_v0 }
 0x282   : > { %v1148_v3 = vpop.permute.xlu1 %1147 }
 0x283   : > { %v1211_v1 = vpop.permute.xlu0 %1210  ;;  %v1152_v5 = vsel %vm483_vm2, %v1146_v61, %v1148_v3  ;;  %v1153_v2 = vsel %vm483_vm2, %v1148_v3, %v1150_v59  ;;  %v1345_v18 = vpop.permute.xlu2 %1344 }
 0x284   : > { %v1161_v7 = vsel %vm1044_vm8, %v1152_v5, 0  ;;  %v1164_v8 = vsel %vm1044_vm8, %v1153_v2, 0  ;;  %v2633_v2 = vld [vmem:[%s3551_s4 + $0xc] sm:$0x3] }
 0x285   : > { %1186 = vmatpush.bf16.msrb.mxu3 %v1161_v7  ;;  %1199 = vmatpush.bf16.msra.mxu0 %v1164_v8 }
 0x288   : > { %2615 = vmatmul.msk.bf16.vlgmr.msrb.gmra.mxu3 %vm1073_vm0, %v2613_v0  ;;  %2616 = vmatmul.msk.bf16.vlgmr.msra.gmra.mxu0 %vm1073_vm0, %v2613_v0 }
 0x28a   : > { %v1213_v11 = vpop.permute.xlu1 %1212 }
 0x28b   : > { %v1217_v10 = vpop.permute.xlu0 %1216  ;;  %v1218_v13 = vsel %vm551_vm3, %v1211_v1, %v1213_v11  ;;  %v1219_v14 = vsel %vm551_vm3, %v1213_v11, %v1215_v60  ;;  %v1351_v28 = vpop.permute.xlu2 %1350 }
 0x28c   : > { %v1220_v12 = vsel %vm551_vm3, %v1215_v60, %v1217_v10  ;;  %v1225_v16 = vsel %vm1044_vm8, %v1218_v13, 0  ;;  %v1228_v17 = vsel %vm1044_vm8, %v1219_v14, 0 }
 0x28d   : > { %v1231_v15 = vsel %vm1044_vm8, %v1220_v12, 0  ;;  %1240 = vmatpush.bf16.msra.mxu1 %v1225_v16  ;;  %1253 = vmatpush.bf16.msra.mxu2 %v1228_v17 }
 0x28e   : > { %1266 = vmatpush.bf16.msra.mxu3 %v1231_v15  ;;  %v2637_v15 = vld [vmem:[%s3551_s4 + $0xe] sm:$0x3] }
 0x290   : > { %2618 = vmatmul.msk.bf16.vlgmr.msra.gmra.mxu1 %vm1073_vm0, %v2617_v19 }
 0x291   : > { %2619 = vmatmul.msk.bf16.vlgmr.msra.gmra.mxu2 %vm1073_vm0, %v2617_v19 }
 0x292   : > { %v1278_v21 = vpop.permute.xlu1 %1277 }
 0x293   : > { %v1282_v20 = vpop.permute.xlu0 %1281  ;;  %v1285_v24 = vsel %vm619_vm4, %v1278_v21, %v1280_v4  ;;  %v1416_v37 = vpop.permute.xlu2 %1415 }
 0x294   : > { %v1286_v22 = vsel %vm619_vm4, %v1280_v4, %v1282_v20  ;;  %v1292_v26 = vsel %vm1044_vm8, %v1285_v24, 0 }
 0x295   : > { %v1295_v25 = vsel %vm1044_vm8, %v1286_v22, 0  ;;  %1307 = vmatpush.bf16.msrb.mxu0 %v1292_v26  ;;  %v1109_v26 = vpop.f32.mrf.mxu0 }
 0x296   : > { %1320 = vmatpush.bf16.msrb.mxu1 %v1295_v25 }
 0x298   : > { %2620 = vmatmul.msk.bf16.vlgmr.msra.gmra.mxu3 %vm1073_vm0, %v2617_v19  ;;  %2622 = vmatmul.msk.bf16.vlgmr.msrb.gmra.mxu0 %vm1073_vm0, %v2621_v27 }
 0x29a   : > { %v1284_v30 = vpop.permute.xlu1 %1283 }
 0x29b   : > { %v1347_v29 = vpop.permute.xlu0 %1346  ;;  %v1287_v33 = vsel %vm619_vm4, %v1282_v20, %v1284_v30  ;;  %v1481_v48 = vpop.permute.xlu2 %1480 }
 0x29c   : > { %v1352_v32 = vsel %vm687_vm5, %v1345_v18, %v1347_v29  ;;  %v1298_v35 = vsel %vm1044_vm8, %v1287_v33, 0 }
 0x29d   : > { %v1359_v34 = vsel %vm1044_vm8, %v1352_v32, 0  ;;  %1333 = vmatpush.bf16.msrb.mxu2 %v1298_v35  ;;  %v1111_v30 = vpop.f32.mrf.mxu0 }
 0x29e   : > { %1374 = vmatpush.bf16.msrb.mxu3 %v1359_v34 }
 0x2a0   : > { %2623 = vmatmul.msk.bf16.vlgmr.msrb.gmra.mxu1 %vm1073_vm0, %v2621_v27 }
 0x2a1   : > { %2624 = vmatmul.msk.bf16.vlgmr.msrb.gmra.mxu2 %vm1073_vm0, %v2621_v27  ;;  %v1122_v27 = vpop.f32.mrf.mxu1 }
 0x2a2   : > { %v1349_v40 = vpop.permute.xlu1 %1348 }
 0x2a3   : > { %v1412_v38 = vpop.permute.xlu0 %1411  ;;  %v1353_v41 = vsel %vm687_vm5, %v1347_v29, %v1349_v40  ;;  %v1354_v42 = vsel %vm687_vm5, %v1349_v40, %v1351_v28  ;;  %v1546_v62 = vpop.permute.xlu2 %1545  ;;  %v2641_v28 = vld [vmem:[%s3551_s4 + $0x10] sm:$0x3] }
 0x2a4   : > { %v1362_v43 = vsel %vm1044_vm8, %v1353_v41, 0  ;;  %v1365_v44 = vsel %vm1044_vm8, %v1354_v42, 0  ;;  %v1096_v29 = vpop.f32.mrf.mxu3 }
 0x2a5   : > { %1387 = vmatpush.bf16.msra.mxu0 %v1362_v43  ;;  %1400 = vmatpush.bf16.msra.mxu1 %v1365_v44 }
 0x2a8   : > { %2626 = vmatmul.msk.bf16.vlgmr.msrb.gmra.mxu3 %vm1073_vm0, %v2625_v45  ;;  %2627 = vmatmul.msk.bf16.vlgmr.msra.gmra.mxu0 %vm1073_vm0, %v2625_v45 }
 0x2a9   : > { %v1124_v32 = vpop.f32.mrf.mxu1 }
 0x2aa   : > { %v1414_v47 = vpop.permute.xlu1 %1413 }
 0x2ab   : > { %v1418_v46 = vpop.permute.xlu0 %1417  ;;  %v1419_v50 = vsel %vm3572_vm6, %v1412_v38, %v1414_v47  ;;  %v1420_v51 = vsel %vm3572_vm6, %v1414_v47, %v1416_v37  ;;  %v1552_v7 = vpop.permute.xlu2 %1551 }
 0x2ac   : > { %v1421_v49 = vsel %vm3572_vm6, %v1416_v37, %v1418_v46  ;;  %v1426_v53 = vsel %vm1044_vm8, %v1419_v50, 0  ;;  %v1429_v54 = vsel %vm1044_vm8, %v1420_v51, 0  ;;  %vm3590_vm6 = vmmov %vm3587_vm9  ;;  %v1098_v33 = vpop.f32.mrf.mxu3 }
 0x2ad   : > { %v1432_v52 = vsel %vm1044_vm8, %v1421_v49, 0  ;;  %1441 = vmatpush.bf16.msra.mxu2 %v1426_v53  ;;  %1454 = vmatpush.bf16.msra.mxu3 %v1429_v54 }
 0x2ae   : > { %1467 = vmatpush.bf16.msrb.mxu0 %v1432_v52 }
 0x2b0   : > { %2628 = vmatmul.msk.bf16.vlgmr.msra.gmra.mxu1 %vm1073_vm0, %v2625_v45 }
 0x2b1   : > { %2630 = vmatmul.msk.bf16.vlgmr.msra.gmra.mxu2 %vm1073_vm0, %v2629_v55 }
 0x2b2   : > { %v1479_v57 = vpop.permute.xlu1 %1478 }
 0x2b3   : > { %v1483_v56 = vpop.permute.xlu0 %1482  ;;  %v1486_v59 = vsel %vm3588_vm11, %v1479_v57, %v1481_v48  ;;  %v1617_v16 = vpop.permute.xlu2 %1616  ;;  %vm3593_vm11 = vcmask 736256  }
 0x2b4   : > { %v1487_v58 = vsel %vm3587_vm9, %v1481_v48, %v1483_v56  ;;  %v1493_v61 = vsel %vm1044_vm8, %v1486_v59, 0  ;;  %vm3591_vm9 = vmmov %vm3589_vm1 }
 0x2b5   : > { %v1496_v60 = vsel %vm1044_vm8, %v1487_v58, 0  ;;  %1508 = vmatpush.bf16.msrb.mxu1 %v1493_v61 }
 0x2b6   : > { %1521 = vmatpush.bf16.msrb.mxu2 %v1496_v60 }
 0x2b8   : > { %2631 = vmatmul.msk.bf16.vlgmr.msra.gmra.mxu3 %vm1073_vm0, %v2629_v55  ;;  %2632 = vmatmul.msk.bf16.vlgmr.msrb.gmra.mxu0 %vm1073_vm0, %v2629_v55 }
 0x2ba   : > { %v1485_v0 = vpop.permute.xlu1 %1484 }
 0x2bb   : > { %v1548_v63 = vpop.permute.xlu0 %1547  ;;  %v1488_v3 = vsel %vm3590_vm6, %v1483_v56, %v1485_v0  ;;  %vm3592_vm6 = vmmov %vm3589_vm1 }
 0x2bc   : > { %v1553_v1 = vsel %vm3589_vm1, %v1546_v62, %v1548_v63  ;;  %v1499_v5 = vsel %vm1044_vm8, %v1488_v3, 0  ;;  %vm3594_vm1 = vmmov %vm3593_vm11 }
 0x2bd   : > { %v1560_v4 = vsel %vm1044_vm8, %v1553_v1, 0  ;;  %1534 = vmatpush.bf16.msrb.mxu3 %v1499_v5 }
 0x2be   : > { %1575 = vmatpush.bf16.msra.mxu0 %v1560_v4 }
 0x2c0   : > { %2634 = vmatmul.msk.bf16.vlgmr.msrb.gmra.mxu1 %vm1073_vm0, %v2633_v2 }
 0x2c1   : > { %2635 = vmatmul.msk.bf16.vlgmr.msrb.gmra.mxu2 %vm1073_vm0, %v2633_v2 }
 0x2c2   : > { %v1550_v10 = vpop.permute.xlu1 %1549 }
 0x2c3   : > { %v1613_v8 = vpop.permute.xlu0 %1612  ;;  %v1554_v11 = vsel %vm3591_vm9, %v1548_v63, %v1550_v10  ;;  %v1555_v12 = vsel %vm3592_vm6, %v1550_v10, %v1552_v7  ;;  %vm3595_vm9 = vmmov %vm3594_vm1  ;;  %vm386_vm6 = vcmask 1043608  }
 0x2c4   : > { %v1563_v13 = vsel %vm1044_vm8, %v1554_v11, 0  ;;  %v1566_v14 = vsel %vm1044_vm8, %v1555_v12, 0  ;;  %387 = vst.msk [vmem:[#allocation2 + $0x1c] sm:$0xf] %vm386_vm6, %v2869_v39  ;;  %vm1702_vm6 = vcmask 152580  }
 0x2c5   : > { %1588 = vmatpush.bf16.msra.mxu1 %v1563_v13  ;;  %1601 = vmatpush.bf16.msra.mxu2 %v1566_v14 }
 0x2c8   : > { %2636 = vmatmul.msk.bf16.vlgmr.msrb.gmra.mxu3 %vm1073_vm0, %v2633_v2  ;;  %2638 = vmatmul.msk.bf16.vlgmr.msra.gmra.mxu0 %vm1073_vm0, %v2637_v15 }
 0x2ca   : > { %v1615_v18 = vpop.permute.xlu1 %1614 }
 0x2cb   : > { %v1619_v17 = vpop.permute.xlu0 %1618  ;;  %v1620_v20 = vsel %vm3594_vm1, %v1613_v8, %v1615_v18  ;;  %v1621_v21 = vsel %vm3595_vm9, %v1615_v18, %v1617_v16  ;;  %vm1699_vm1 = vcmask 1045508  }
 0x2cc   : > { %v1622_v19 = vsel %vm3593_vm11, %v1617_v16, %v1619_v17  ;;  %v1627_v24 = vsel %vm1044_vm8, %v1620_v20, 0  ;;  %v1630_v25 = vsel %vm1044_vm8, %v1621_v21, 0  ;;  %vm1698_vm11 = vcmask 1041560  }
 0x2cd   : > { %v1633_v22 = vsel %vm1044_vm8, %v1622_v19, 0  ;;  %1642 = vmatpush.bf16.msra.mxu3 %v1627_v24  ;;  %1655 = vmatpush.bf16.msrb.mxu0 %v1630_v25  ;;  %vm1700_vm9 = vmor %vm1699_vm1, %vm1698_vm11  ;;  %vm3596_vm11 = vcmask 1041408  }
 0x2ce   : > { %1668 = vmatpush.bf16.msrb.mxu1 %v1633_v22  ;;  %vm1703_vm1 = vmor %vm1702_vm6, %vm3596_vm11 }
 0x2d0   : > { %2639 = vmatmul.msk.bf16.vlgmr.msra.gmra.mxu1 %vm1073_vm0, %v2637_v15 }
 0x2d1   : > { %2640 = vmatmul.msk.bf16.vlgmr.msra.gmra.mxu2 %vm1073_vm0, %v2637_v15 }
 0x2d2   : > { %v1060_v34 = vpop.permute.xlu1 %1059 }
 0x2d3   : > { %v1126_v35 = vadd.f32 %v1096_v29, %v1060_v34  ;;  %v1128_v40 = vadd.f32 %v1122_v27, %v1060_v34  ;;  %v1127_v43 = vadd.f32 %v1109_v26, %v1060_v34 }
 0x2d8   : > { %2642 = vmatmul.msk.bf16.vlgmr.msra.gmra.mxu3 %vm1073_vm0, %v2641_v28  ;;  %2643 = vmatmul.msk.bf16.vlgmr.msrb.gmra.mxu0 %vm1073_vm0, %v2641_v28 }
 0x2e0   : > { %2644 = vmatmul.msk.bf16.vlgmr.msrb.gmra.mxu1 %vm1073_vm0, %v2641_v28  ;;  %vm382_vm0 = vcmask 150528  }
 0x2e1   : > { %383 = vst.msk [vmem:[#allocation2 + $0x10] sm:$0xf] %vm382_vm0, %v2869_v39  ;;  %vm1733_vm0 = vcmask 1045504  }
 0x304   : > { %v1175_v37 = vpop.f32.mrf.mxu2 }
 0x305   : > { %v1205_v38 = vadd.f32 %v1175_v37, %v1126_v35  ;;  %v1201_v41 = vpop.f32.mrf.mxu0 }
 0x306   : > { %v1207_v42 = vadd.f32 %v1201_v41, %v1128_v40 }
 0x30b   : > { %v1188_v45 = vpop.f32.mrf.mxu3 }
 0x30c   : > { %v1177_v44 = vpop.f32.mrf.mxu2  ;;  %v1206_v46 = vadd.f32 %v1188_v45, %v1127_v43 }
 0x30d   : > { %v1203_v47 = vpop.f32.mrf.mxu0  ;;  %v1242_v48 = vpop.f32.mrf.mxu1 }
 0x30e   : > { %v1272_v49 = vadd.f32 %v1242_v48, %v1205_v38 }
 0x313   : > { %v1190_v50 = vpop.f32.mrf.mxu3 }
 0x314   : > { %v1255_v51 = vpop.f32.mrf.mxu2 }
 0x315   : > { %v1244_v52 = vpop.f32.mrf.mxu1  ;;  %v1309_v53 = vpop.f32.mrf.mxu0  ;;  %v1273_v17 = vadd.f32 %v1255_v51, %v1206_v46 }
 0x316   : > { %v1339_v24 = vadd.f32 %v1309_v53, %v1272_v49 }
 0x31b   : > { %v1268_v54 = vpop.f32.mrf.mxu3 }
 0x31c   : > { %v1257_v55 = vpop.f32.mrf.mxu2  ;;  %v1274_v25 = vadd.f32 %v1268_v54, %v1207_v42 }
 0x31d   : > { %v1311_v56 = vpop.f32.mrf.mxu0  ;;  %v1322_v57 = vpop.f32.mrf.mxu1 }
 0x31e   : > { %v1340_v21 = vadd.f32 %v1322_v57, %v1273_v17 }
 0x323   : > { %v1270_v58 = vpop.f32.mrf.mxu3 }
 0x324   : > { %v1335_v59 = vpop.f32.mrf.mxu2 }
 0x325   : > { %v1324_v60 = vpop.f32.mrf.mxu1  ;;  %v1389_v61 = vpop.f32.mrf.mxu0  ;;  %v1341_v28 = vadd.f32 %v1335_v59, %v1274_v25 }
 0x326   : > { %v1407_v22 = vadd.f32 %v1389_v61, %v1340_v21  ;;  %v2735_v21 = vld [vmem:[#allocation2 + $0xc] sm:$0xf] }
 0x32b   : > { %v1376_v62 = vpop.f32.mrf.mxu3 }
 0x32c   : > { %v1337_v63 = vpop.f32.mrf.mxu2  ;;  %v1406_v29 = vadd.f32 %v1376_v62, %v1339_v24 }
 0x32d   : > { %v1391_v0 = vpop.f32.mrf.mxu0  ;;  %v1402_v1 = vpop.f32.mrf.mxu1 }
 0x32e   : > { %v1408_v35 = vadd.f32 %v1402_v1, %v1341_v28  ;;  %v2734_v1 = vld [vmem:[#allocation2 + $0x4] sm:$0xf] }
 0x333   : > { %v1378_v3 = vpop.f32.mrf.mxu3 }
 0x334   : > { %v1443_v4 = vpop.f32.mrf.mxu2  ;;  %v2647_v3 = vld [vmem:[#allocation2] sm:$0xf] }
 0x335   : > { %v1404_v5 = vpop.f32.mrf.mxu1  ;;  %v1469_v2 = vpop.f32.mrf.mxu0  ;;  %v1473_v37 = vadd.f32 %v1443_v4, %v1406_v29  ;;  %v2731_v4 = vld [vmem:[#allocation2 + $0x4] sm:$0xf] }
 0x336   : > { %v1475_v40 = vadd.f32 %v1469_v2, %v1408_v35 }
 0x33b   : > { %v1456_v7 = vpop.f32.mrf.mxu3 }
 0x33c   : > { %v1445_v8 = vpop.f32.mrf.mxu2  ;;  %v1474_v26 = vadd.f32 %v1456_v7, %v1407_v22  ;;  %v2655_v22 = vld [vmem:[#allocation2 + $0x8] sm:$0xf] }
 0x33d   : > { %v1471_v10 = vpop.f32.mrf.mxu0  ;;  %v1510_v11 = vpop.f32.mrf.mxu1 }
 0x33e   : > { %v1540_v41 = vadd.f32 %v1510_v11, %v1473_v37 }
 0x343   : > { %v1458_v12 = vpop.f32.mrf.mxu3 }
 0x344   : > { %v1523_v13 = vpop.f32.mrf.mxu2 }
 0x345   : > { %v1512_v14 = vpop.f32.mrf.mxu1  ;;  %v1577_v15 = vpop.f32.mrf.mxu0  ;;  %v1541_v30 = vadd.f32 %v1523_v13, %v1474_v26 }
 0x346   : > { %v1607_v44 = vadd.f32 %v1577_v15, %v1540_v41  ;;  %v2663_v14 = vld [vmem:[#allocation2] sm:$0xf] }
 0x34b   : > { %v1536_v16 = vpop.f32.mrf.mxu3 }
 0x34c   : > { %v1525_v18 = vpop.f32.mrf.mxu2  ;;  %v1542_v45 = vadd.f32 %v1536_v16, %v1475_v40  ;;  %v2660_v40 = vld [vmem:[%s3553_s6 + $0x2] sm:$0x3] }
 0x34d   : > { %v1579_v19 = vpop.f32.mrf.mxu0  ;;  %v1590_v20 = vpop.f32.mrf.mxu1 }
 0x34e   : > { %v1608_v38 = vadd.f32 %v1590_v20, %v1541_v30  ;;  %v2671_v20 = vld [vmem:[#allocation2 + $0x8] sm:$0xf] }
 0x353   : > { %v1538_v27 = vpop.f32.mrf.mxu3 }
 0x354   : > { %v1603_v32 = vpop.f32.mrf.mxu2 }
 0x355   : > { %v1592_v33 = vpop.f32.mrf.mxu1  ;;  %v1657_v34 = vpop.f32.mrf.mxu0  ;;  %v1609_v47 = vadd.f32 %v1603_v32, %v1542_v45  ;;  %v1715_v32 = vld [vmem:[%s3553_s6] sm:$0x3] }
 0x356   : > { %v1675_v43 = vadd.f32 %v1657_v34, %v1608_v38  ;;  %v1705_v34 = vld [vmem:[%s3554_s7] sm:$0xf] }
 0x358   : > { %v1678_v48 = vmax.f32 %v1675_v43, 0.0 }
 0x35a   : > { %v1681_v54 = vsel %vm3148_vm14, %v1678_v48, 0.0 }
 0x35b   : > { %v1644_v46 = vpop.f32.mrf.mxu3 }
 0x35c   : > { %v1605_v42 = vpop.f32.mrf.mxu2  ;;  %v1674_v49 = vadd.f32 %v1644_v46, %v1607_v44 }
 0x35d   : > { %v1670_v50 = vpop.f32.mrf.mxu1  ;;  %v1659_v51 = vpop.f32.mrf.mxu0 }
 0x35e   : > { %v1677_v52 = vmax.f32 %v1674_v49, 0.0  ;;  %v1676_v53 = vadd.f32 %v1670_v50, %v1609_v47 }
 0x360   : > { %v1680_v55 = vsel %vm3144_vm13, %v1677_v52, 0.0  ;;  %v1679_v56 = vmax.f32 %v1676_v53, 0.0  ;;  %v2680_v53 = vld [vmem:[%s3553_s6 + $0x4] sm:$0x3] }
 0x361   : > { %v1683_v57 = vpack.c.bf16 %v1681_v54, %v1680_v55 }
 0x362   : > { %v1682_v58 = vsel %vm3156_vm15, %v1679_v56, 0.0 }
 0x363   : > { %v1684_v59 = vpack.c.bf16 %v1682_v58, %v1682_v58  ;;  %1687 = vrot.lane.b32.xlu2 %v1683_v57, %s2870_s25  ;;  %v1646_v60 = vpop.f32.mrf.mxu3 }
 0x365   : > { %v1672_v61 = vpop.f32.mrf.mxu1  ;;  %1689 = vrot.lane.b32.xlu0 %v1684_v59, %s2870_s25 }
 0x3bd   : > { %v1688_v62 = vpop.permute.xlu2 %1687 }
 0x3be   : > { %v1691_v63 = vrot.slane %v1688_v62, 4 }
 0x3c0   : > { %v1693_v0 = vsel %vm1042_vm10, %v1691_v63, %v1688_v62 }
 0x3c1   : > { %1701 = vst.msk [vmem:[#allocation2 + $0x10] sm:$0x33] %vm1700_vm9, %v1693_v0  ;;  %vm1729_vm9 = vcmask 97280  }
 0x3c8   : > { %v2665_v5 = vld [vmem:[#allocation2 + $0x10] sm:$0x30]  ;;  %v2732_v2 = vld [vmem:[#allocation2 + $0xc] sm:$0x30] }
 0x3c9   : > { %v2649_v7 = vld [vmem:[#allocation2 + $0x10] sm:$0x30]  ;;  %v2668_v8 = vor.u32 %v2734_v1, %v2665_v5  ;;  %v2648_v10 = vor.u32 %v2732_v2, %v2647_v3  ;;  %v2736_v13 = vld [vmem:[#allocation2 + $0xc] sm:$0x30] }
 0x3ca   : > { %v2652_v11 = vor.u32 %v2731_v4, %v2649_v7  ;;  %v2664_v15 = vor.u32 %v2736_v13, %v2663_v14  ;;  %v2684_v7 = vld [vmem:[%s3553_s6 + $0x6] sm:$0x3] }
 0x3cb   : > { %1809 = vrot.lane.b32.xlu1 %v2668_v8, %s2862_s11  ;;  %v1735_v39 = vsel %vm1733_vm0, %v2648_v10, 0 }
 0x3cc   : > { %v1738_v12 = vsel %vm1733_vm0, %v2652_v11, 0  ;;  %1750 = vmatpush.bf16.msrb.mxu2 %v1735_v39 }
 0x3cd   : > { %1763 = vmatpush.bf16.msrb.mxu3 %v1738_v12 }
 0x3cf   : > { %2657 = vmatmul.msk.bf16.vlgmr.msrb.gmra.mxu2 %vm1729_vm9, %v1715_v32 }
 0x3d0   : > { %2658 = vmatmul.msk.bf16.vlgmr.msrb.gmra.mxu3 %vm1729_vm9, %v1715_v32 }
 0x3d3   : > { %1807 = vrot.lane.b32.xlu1 %v2664_v15, %s2862_s11 }
 0x3d7   : > { %v1690_v16 = vpop.permute.xlu0 %1689 }
 0x3d8   : > { %v1692_v17 = vrot.slane %v1690_v16, 4 }
 0x3da   : > { %v1694_v18 = vsel %vm1044_vm8, %v1691_v63, %v1692_v17 }
 0x3db   : > { %v1695_v19 = vsel %vm1042_vm10, %v1694_v18, %v1690_v16 }
 0x3dc   : > { %1704 = vst.msk [vmem:[#allocation2 + $0x18] sm:$0x33] %vm1703_vm1, %v1695_v19  ;;  %vm3605_vm1 = vcmask 744448  }
 0x3e3   : > { %v2737_v24 = vld [vmem:[#allocation2 + $0x14] sm:$0x30]  ;;  %v2673_v25 = vld [vmem:[#allocation2 + $0x18] sm:$0x30] }
 0x3e4   : > { %v2733_v26 = vld [vmem:[#allocation2 + $0x14] sm:$0x30]  ;;  %v2672_v27 = vor.u32 %v2737_v24, %v2671_v20  ;;  %v2676_v28 = vor.u32 %v2735_v21, %v2673_v25 }
 0x3e5   : > { %v2656_v29 = vor.u32 %v2733_v26, %v2655_v22 }
 0x3e6   : > { %1811 = vrot.lane.b32.xlu2 %v2672_v27, %s2862_s11  ;;  %1813 = vrot.lane.b32.xlu0 %v2676_v28, %s2862_s11  ;;  %s3598_s11 = smov 108  }
 0x3e7   : > { %v1741_v30 = vsel %vm1733_vm0, %v2656_v29, 0  ;;  %1878 = vrot.lane.b32.xlu1 %v2672_v27, %s2861_s30 }
 0x3e8   : > { %1776 = vmatpush.bf16.msra.mxu0 %v1741_v30 }
 0x3eb   : > { %2659 = vmatmul.msk.bf16.vlgmr.msra.gmra.mxu0 %vm1729_vm9, %v1715_v32 }
 0x3ee   : > { %1874 = vrot.lane.b32.xlu2 %v2664_v15, %s2861_s30  ;;  %1876 = vrot.lane.b32.xlu0 %v2668_v8, %s2861_s30 }
 0x3ef   : > { %1943 = vrot.lane.b32.xlu1 %v2668_v8, %s2863_s12 }
 0x3f6   : > { %1880 = vrot.lane.b32.xlu2 %v2676_v28, %s2861_s30  ;;  %1941 = vrot.lane.b32.xlu0 %v2664_v15, %s2863_s12  ;;  %s3599_s30 = smov 92  }
 0x3f7   : > { %2010 = vrot.lane.b32.xlu1 %v2668_v8, %s3597_s20 }
 0x3fe   : > { %1945 = vrot.lane.b32.xlu2 %v2672_v27, %s2863_s12  ;;  %2008 = vrot.lane.b32.xlu0 %v2664_v15, %s3597_s20 }
 0x3ff   : > { %2014 = vrot.lane.b32.xlu1 %v2676_v28, %s3597_s20 }
 0x406   : > { %2012 = vrot.lane.b32.xlu2 %v2672_v27, %s3597_s20  ;;  %1947 = vrot.lane.b32.xlu0 %v2676_v28, %s2863_s12 }
 0x407   : > { %2081 = vrot.lane.b32.xlu1 %v2676_v28, %s3598_s11 }
 0x40e   : > { %2077 = vrot.lane.b32.xlu2 %v2668_v8, %s3598_s11  ;;  %2079 = vrot.lane.b32.xlu0 %v2672_v27, %s3598_s11 }
 0x40f   : > { %2144 = vrot.lane.b32.xlu1 %v2668_v8, %s3599_s30 }
 0x416   : > { %2075 = vrot.lane.b32.xlu2 %v2664_v15, %s3598_s11  ;;  %2142 = vrot.lane.b32.xlu0 %v2664_v15, %s3599_s30 }
 0x417   : > { %2209 = vrot.lane.b32.xlu1 %v2664_v15, %s3585_s26 }
 0x41e   : > { %2146 = vrot.lane.b32.xlu2 %v2672_v27, %s3599_s30  ;;  %2148 = vrot.lane.b32.xlu0 %v2676_v28, %s3599_s30 }
 0x41f   : > { %2276 = vrot.lane.b32.xlu1 %v2664_v15, %s3586_s27  ;;  %v2688_v15 = vld [vmem:[%s3553_s6 + $0x8] sm:$0x3] }
 0x426   : > { %2211 = vrot.lane.b32.xlu2 %v2668_v8, %s3585_s26  ;;  %2213 = vrot.lane.b32.xlu0 %v2672_v27, %s3585_s26 }
 0x427   : > { %2215 = vrot.lane.b32.xlu1 %v2676_v28, %s3585_s26 }
 0x42e   : > { %2278 = vrot.lane.b32.xlu2 %v2668_v8, %s3586_s27  ;;  %2280 = vrot.lane.b32.xlu0 %v2672_v27, %s3586_s27 }
 0x436   : > { %2282 = vrot.lane.b32.xlu2 %v2676_v28, %s3586_s27  ;;  %1708 = vperm.xlu0 %2796, %v1705_v34   ;;  %s2509_s27 = sshll.u32 %s2505_s21, 4  ;;  %s2510_s27 = int_to_ptr.hbm [resolvable:$true] %s2509_s27 }
 0x43d   : > { %v1810_v33 = vpop.permute.xlu1 %1809 }
 0x440   : > { %v1812_v35 = vpop.permute.xlu2 %1811 }
 0x441   : > { %v1816_v37 = vsel %vm483_vm2, %v1810_v33, %v1812_v35 }
 0x442   : > { %v1825_v38 = vsel %vm1733_vm0, %v1816_v37, 0 }
 0x443   : > { %1850 = vmatpush.bf16.msra.mxu2 %v1825_v38 }
 0x445   : > { %v1808_v41 = vpop.permute.xlu1 %1807 }
 0x446   : > { %v1815_v43 = vsel %vm483_vm2, %v1808_v41, %v1810_v33  ;;  %2678 = vmatmul.msk.bf16.vlgmr.msra.gmra.mxu2 %vm1729_vm9, %v2660_v40  ;;  %v2692_v33 = vld [vmem:[%s3553_s6 + $0xa] sm:$0x3] }
 0x447   : > { %v1822_v44 = vsel %vm1733_vm0, %v1815_v43, 0 }
 0x448   : > { %v1875_v45 = vpop.permute.xlu2 %1874  ;;  %1837 = vmatpush.bf16.msra.mxu1 %v1822_v44 }
 0x44b   : > { %2677 = vmatmul.msk.bf16.vlgmr.msra.gmra.mxu1 %vm1729_vm9, %v2660_v40 }
 0x450   : > { %v1881_v46 = vpop.permute.xlu2 %1880 }
 0x458   : > { %v1814_v47 = vpop.permute.xlu0 %1813  ;;  %v1946_v48 = vpop.permute.xlu2 %1945 }
 0x459   : > { %v1817_v42 = vsel %vm483_vm2, %v1812_v35, %v1814_v47  ;;  %v1879_v49 = vpop.permute.xlu1 %1878  ;;  %vm3600_vm2 = vcmask 883712  }
 0x45a   : > { %v1828_v50 = vsel %vm1733_vm0, %v1817_v42, 0  ;;  %v1884_v51 = vsel %vm551_vm3, %v1879_v49, %v1881_v46  ;;  %vm3602_vm6 = vmmov %vm3600_vm2 }
 0x45b   : > { %v1895_v52 = vsel %vm1733_vm0, %v1884_v51, 0  ;;  %1863 = vmatpush.bf16.msra.mxu3 %v1828_v50  ;;  %v2696_v50 = vld [vmem:[%s3553_s6 + $0xc] sm:$0x3] }
 0x45c   : > { %1930 = vmatpush.bf16.msrb.mxu2 %v1895_v52 }
 0x45e   : > { %2679 = vmatmul.msk.bf16.vlgmr.msra.gmra.mxu3 %vm1729_vm9, %v2660_v40 }
 0x45f   : > { %2683 = vmatmul.msk.bf16.vlgmr.msrb.gmra.mxu2 %vm1729_vm9, %v2680_v53 }
 0x460   : > { %v2013_v54 = vpop.permute.xlu2 %2012  ;;  %v1877_v55 = vpop.permute.xlu0 %1876 }
 0x461   : > { %v1882_v56 = vsel %vm551_vm3, %v1875_v45, %v1877_v55  ;;  %v1883_v57 = vsel %vm551_vm3, %v1877_v55, %v1879_v49  ;;  %v1944_v58 = vpop.permute.xlu1 %1943  ;;  %vm3601_vm3 = vmmov %vm3600_vm2 }
 0x462   : > { %v1889_v59 = vsel %vm1733_vm0, %v1882_v56, 0  ;;  %v1892_v60 = vsel %vm1733_vm0, %v1883_v57, 0  ;;  %v1950_v61 = vsel %vm619_vm4, %v1944_v58, %v1946_v48  ;;  %v2700_v57 = vld [vmem:[%s3553_s6 + $0xe] sm:$0x3] }
 0x463   : > { %v1959_v62 = vsel %vm1733_vm0, %v1950_v61, 0  ;;  %1904 = vmatpush.bf16.msrb.mxu0 %v1889_v59  ;;  %1917 = vmatpush.bf16.msrb.mxu1 %v1892_v60 }
 0x466   : > { %2681 = vmatmul.msk.bf16.vlgmr.msrb.gmra.mxu0 %vm1729_vm9, %v2680_v53  ;;  %2682 = vmatmul.msk.bf16.vlgmr.msrb.gmra.mxu1 %vm1729_vm9, %v2680_v53 }
 0x467   : > { %1984 = vmatpush.bf16.msra.mxu0 %v1959_v62 }
 0x468   : > { %v1942_v63 = vpop.permute.xlu0 %1941  ;;  %v2078_v0 = vpop.permute.xlu2 %2077 }
 0x469   : > { %v1949_v1 = vsel %vm619_vm4, %v1942_v63, %v1944_v58  ;;  %v2011_v3 = vpop.permute.xlu1 %2010  ;;  %v1778_v60 = vpop.f32.mrf.mxu0 }
 0x46a   : > { %v1956_v4 = vsel %vm1733_vm0, %v1949_v1, 0  ;;  %v2017_v5 = vsel %vm687_vm5, %v2011_v3, %v2013_v54  ;;  %v2704_v1 = vld [vmem:[%s3553_s6 + $0x10] sm:$0x3] }
 0x46b   : > { %v2026_v2 = vsel %vm1733_vm0, %v2017_v5, 0  ;;  %1971 = vmatpush.bf16.msrb.mxu3 %v1956_v4  ;;  %v1765_v4 = vpop.f32.mrf.mxu3 }
 0x46e   : > { %2685 = vmatmul.msk.bf16.vlgmr.msrb.gmra.mxu3 %vm1729_vm9, %v2684_v7 }
 0x46f   : > { %2051 = vmatpush.bf16.msra.mxu3 %v2026_v2 }
 0x470   : > { %v2009_v8 = vpop.permute.xlu0 %2008  ;;  %v2076_v13 = vpop.permute.xlu2 %2075 }
 0x471   : > { %v2016_v10 = vsel %vm687_vm5, %v2009_v8, %v2011_v3  ;;  %v2015_v11 = vpop.permute.xlu1 %2014  ;;  %v2083_v16 = vsel %vm3600_vm2, %v2076_v13, %v2078_v0  ;;  %v1752_v3 = vpop.f32.mrf.mxu2 }
 0x472   : > { %v2023_v39 = vsel %vm1733_vm0, %v2016_v10, 0  ;;  %v2018_v12 = vsel %vm687_vm5, %v2013_v54, %v2015_v11  ;;  %v2090_v21 = vsel %vm1733_vm0, %v2083_v16, 0  ;;  %v1780_v5 = vpop.f32.mrf.mxu0 }
 0x473   : > { %v2029_v14 = vsel %vm1733_vm0, %v2018_v12, 0  ;;  %2038 = vmatpush.bf16.msra.mxu2 %v2023_v39 }
 0x474   : > { %2064 = vmatpush.bf16.msrb.mxu0 %v2029_v14 }
 0x476   : > { %2686 = vmatmul.msk.bf16.vlgmr.msra.gmra.mxu0 %vm1729_vm9, %v2684_v7  ;;  %2689 = vmatmul.msk.bf16.vlgmr.msra.gmra.mxu2 %vm1729_vm9, %v2688_v15 }
 0x478   : > { %v1948_v17 = vpop.permute.xlu0 %1947  ;;  %v2147_v22 = vpop.permute.xlu2 %2146 }
 0x479   : > { %v1951_v18 = vsel %vm619_vm4, %v1946_v48, %v1948_v17  ;;  %v2082_v19 = vpop.permute.xlu1 %2081  ;;  %vm3603_vm4 = vcmask 752640   ;;  %v1754_v2 = vpop.f32.mrf.mxu2 }
 0x47a   : > { %v1962_v20 = vsel %vm1733_vm0, %v1951_v18, 0  ;;  %vm3604_vm11 = vmmov %vm3603_vm4 }
 0x47b   : > { %1997 = vmatpush.bf16.msra.mxu1 %v1962_v20  ;;  %vm3606_vm2 = vmmov %vm3603_vm4 }
 0x47e   : > { %2687 = vmatmul.msk.bf16.vlgmr.msra.gmra.mxu1 %vm1729_vm9, %v2684_v7  ;;  %2690 = vmatmul.msk.bf16.vlgmr.msra.gmra.mxu3 %vm1729_vm9, %v2688_v15  ;;  %v1767_v7 = vpop.f32.mrf.mxu3 }
 0x47f   : > { %2105 = vmatpush.bf16.msrb.mxu1 %v2090_v21 }
 0x480   : > { %v2080_v24 = vpop.permute.xlu0 %2079  ;;  %v2212_v34 = vpop.permute.xlu2 %2211 }
 0x481   : > { %v2084_v25 = vsel %vm3601_vm3, %v2078_v0, %v2080_v24  ;;  %v2085_v26 = vsel %vm3602_vm6, %v2080_v24, %v2082_v19  ;;  %v2145_v27 = vpop.permute.xlu1 %2144  ;;  %vm3607_vm3 = vcmask 736256   ;;  %vm3608_vm6 = vmmov %vm3605_vm1 }
 0x482   : > { %v2093_v28 = vsel %vm1733_vm0, %v2084_v25, 0  ;;  %v2096_v29 = vsel %vm1733_vm0, %v2085_v26, 0  ;;  %v2151_v30 = vsel %vm3603_vm4, %v2145_v27, %v2147_v22  ;;  %vm3609_vm4 = vmmov %vm3605_vm1 }
 0x483   : > { %v2160_v32 = vsel %vm1733_vm0, %v2151_v30, 0  ;;  %2118 = vmatpush.bf16.msrb.mxu2 %v2093_v28  ;;  %2131 = vmatpush.bf16.msrb.mxu3 %v2096_v29 }
 0x484   : > { %2185 = vmatpush.bf16.msra.mxu1 %v2160_v32 }
 0x486   : > { %2691 = vmatmul.msk.bf16.vlgmr.msrb.gmra.mxu0 %vm1729_vm9, %v2688_v15  ;;  %2694 = vmatmul.msk.bf16.vlgmr.msrb.gmra.mxu2 %vm1729_vm9, %v2692_v33 }
 0x488   : > { %v2143_v35 = vpop.permute.xlu0 %2142  ;;  %v2279_v45 = vpop.permute.xlu2 %2278 }
 0x489   : > { %v2150_v37 = vsel %vm3604_vm11, %v2143_v35, %v2145_v27  ;;  %v2210_v38 = vpop.permute.xlu1 %2209  ;;  %vm3610_vm11 = vmmov %vm3607_vm3 }
 0x48a   : > { %v2157_v40 = vsel %vm1733_vm0, %v2150_v37, 0  ;;  %v2217_v41 = vsel %vm3605_vm1, %v2210_v38, %v2212_v34  ;;  %vm3611_vm1 = vmmov %vm3607_vm3 }
 0x48b   : > { %v2224_v43 = vsel %vm1733_vm0, %v2217_v41, 0  ;;  %2172 = vmatpush.bf16.msra.mxu0 %v2157_v40 }
 0x48c   : > { %2239 = vmatpush.bf16.msra.mxu3 %v2224_v43 }
 0x48e   : > { %2693 = vmatmul.msk.bf16.vlgmr.msrb.gmra.mxu1 %vm1729_vm9, %v2692_v33  ;;  %2695 = vmatmul.msk.bf16.vlgmr.msrb.gmra.mxu3 %vm1729_vm9, %v2692_v33 }
 0x490   : > { %v2149_v44 = vpop.permute.xlu0 %2148  ;;  %v2283_v58 = vpop.permute.xlu2 %2282 }
 0x491   : > { %v2152_v46 = vsel %vm3606_vm2, %v2147_v22, %v2149_v44  ;;  %v2277_v47 = vpop.permute.xlu1 %2276 }
 0x492   : > { %v2163_v48 = vsel %vm1733_vm0, %v2152_v46, 0  ;;  %v2284_v42 = vsel %vm3607_vm3, %v2277_v47, %v2279_v45 }
 0x493   : > { %v2291_v49 = vsel %vm1733_vm0, %v2284_v42, 0  ;;  %2198 = vmatpush.bf16.msra.mxu2 %v2163_v48 }
 0x496   : > { %2697 = vmatmul.msk.bf16.vlgmr.msra.gmra.mxu0 %vm1729_vm9, %v2696_v50  ;;  %2699 = vmatmul.msk.bf16.vlgmr.msra.gmra.mxu2 %vm1729_vm9, %v2696_v50 }
 0x497   : > { %2306 = vmatpush.bf16.msrb.mxu2 %v2291_v49 }
 0x498   : > { %v2214_v51 = vpop.permute.xlu0 %2213 }
 0x499   : > { %v2218_v52 = vsel %vm3608_vm6, %v2212_v34, %v2214_v51  ;;  %v2216_v53 = vpop.permute.xlu1 %2215 }
 0x49a   : > { %v2227_v54 = vsel %vm1733_vm0, %v2218_v52, 0  ;;  %v2219_v55 = vsel %vm3609_vm4, %v2214_v51, %v2216_v53 }
 0x49b   : > { %v2230_v56 = vsel %vm1733_vm0, %v2219_v55, 0  ;;  %2252 = vmatpush.bf16.msrb.mxu0 %v2227_v54 }
 0x49c   : > { %2265 = vmatpush.bf16.msrb.mxu1 %v2230_v56 }
 0x49e   : > { %2698 = vmatmul.msk.bf16.vlgmr.msra.gmra.mxu1 %vm1729_vm9, %v2696_v50  ;;  %2701 = vmatmul.msk.bf16.vlgmr.msra.gmra.mxu3 %vm1729_vm9, %v2700_v57 }
 0x4a0   : > { %v2281_v59 = vpop.permute.xlu0 %2280 }
 0x4a1   : > { %v2285_v61 = vsel %vm3610_vm11, %v2279_v45, %v2281_v59  ;;  %v2286_v62 = vsel %vm3611_vm1, %v2281_v59, %v2283_v58 }
 0x4a2   : > { %v2294_v63 = vsel %vm1733_vm0, %v2285_v61, 0  ;;  %v2297_v0 = vsel %vm1733_vm0, %v2286_v62, 0 }
 0x4a3   : > { %2319 = vmatpush.bf16.msrb.mxu3 %v2294_v63  ;;  %2332 = vmatpush.bf16.msra.mxu0 %v2297_v0 }
 0x4a6   : > { %2702 = vmatmul.msk.bf16.vlgmr.msrb.gmra.mxu0 %vm1729_vm9, %v2700_v57  ;;  %2705 = vmatmul.msk.bf16.vlgmr.msrb.gmra.mxu2 %vm1729_vm9, %v2704_v1 }
 0x4a8   : > { %v1709_v8 = vpop.permute.xlu0 %1708 }
 0x4a9   : > { %v1782_v10 = vadd.f32 %v1752_v3, %v1709_v8  ;;  %v1783_v11 = vadd.f32 %v1765_v4, %v1709_v8  ;;  %v1784_v17 = vadd.f32 %v1778_v60, %v1709_v8 }
 0x4ae   : > { %2703 = vmatmul.msk.bf16.vlgmr.msrb.gmra.mxu1 %vm1729_vm9, %v2700_v57  ;;  %2706 = vmatmul.msk.bf16.vlgmr.msrb.gmra.mxu3 %vm1729_vm9, %v2704_v1 }
 0x4b6   : > { %2707 = vmatmul.msk.bf16.vlgmr.msra.gmra.mxu0 %vm1729_vm9, %v2704_v1 }
 0x4c8   : > { %v1839_v39 = vpop.f32.mrf.mxu1 }
 0x4c9   : > { %v1869_v12 = vadd.f32 %v1839_v39, %v1782_v10  ;;  %v1852_v13 = vpop.f32.mrf.mxu2 }
 0x4ca   : > { %v1870_v14 = vadd.f32 %v1852_v13, %v1783_v11 }
 0x4d0   : > { %v1841_v15 = vpop.f32.mrf.mxu1 }
 0x4d1   : > { %v1854_v16 = vpop.f32.mrf.mxu2 }
 0x4e1   : > { %v1865_v18 = vpop.f32.mrf.mxu3 }
 0x4e2   : > { %v1871_v19 = vadd.f32 %v1865_v18, %v1784_v17  ;;  %v1932_v20 = vpop.f32.mrf.mxu2 }
 0x4e3   : > { %v1906_v21 = vpop.f32.mrf.mxu0  ;;  %v1919_v22 = vpop.f32.mrf.mxu1 }
 0x4e4   : > { %v1936_v24 = vadd.f32 %v1906_v21, %v1869_v12  ;;  %v1937_v25 = vadd.f32 %v1919_v22, %v1870_v14  ;;  %v1938_v26 = vadd.f32 %v1932_v20, %v1871_v19 }
 0x4e9   : > { %v1867_v27 = vpop.f32.mrf.mxu3 }
 0x4ea   : > { %v1934_v28 = vpop.f32.mrf.mxu2 }
 0x4eb   : > { %v1908_v29 = vpop.f32.mrf.mxu0  ;;  %v1921_v30 = vpop.f32.mrf.mxu1 }
 0x4f1   : > { %v1973_v32 = vpop.f32.mrf.mxu3 }
 0x4f2   : > { %v2003_v60 = vadd.f32 %v1973_v32, %v1936_v24 }
 0x4f3   : > { %v1986_v33 = vpop.f32.mrf.mxu0 }
 0x4f4   : > { %v2004_v62 = vadd.f32 %v1986_v33, %v1937_v25 }
 0x4f9   : > { %v1975_v34 = vpop.f32.mrf.mxu3  ;;  %v2040_v35 = vpop.f32.mrf.mxu2 }
 0x4fa   : > { %v2070_v61 = vadd.f32 %v2040_v35, %v2003_v60 }
 0x4fb   : > { %v1988_v37 = vpop.f32.mrf.mxu0  ;;  %v1999_v38 = vpop.f32.mrf.mxu1 }
 0x4fc   : > { %v2005_v3 = vadd.f32 %v1999_v38, %v1938_v26 }
 0x501   : > { %v2042_v40 = vpop.f32.mrf.mxu2  ;;  %v2053_v41 = vpop.f32.mrf.mxu3 }
 0x502   : > { %v2071_v4 = vadd.f32 %v2053_v41, %v2004_v62 }
 0x503   : > { %v2001_v43 = vpop.f32.mrf.mxu1  ;;  %v2066_v44 = vpop.f32.mrf.mxu0 }
 0x504   : > { %v2072_v8 = vadd.f32 %v2066_v44, %v2005_v3  ;;  %v2738_v44 = vld [vmem:[#allocation2 + $0x4] sm:$0xf] }
 0x509   : > { %v2055_v45 = vpop.f32.mrf.mxu3  ;;  %v2120_v46 = vpop.f32.mrf.mxu2 }
 0x50a   : > { %v2138_v10 = vadd.f32 %v2120_v46, %v2071_v4  ;;  %v2718_v46 = vld [vmem:[#allocation2 + $0x8] sm:$0xf] }
 0x50b   : > { %v2068_v47 = vpop.f32.mrf.mxu0  ;;  %v2107_v48 = vpop.f32.mrf.mxu1 }
 0x50c   : > { %v2137_v63 = vadd.f32 %v2107_v48, %v2070_v61 }
 0x511   : > { %v2122_v42 = vpop.f32.mrf.mxu2  ;;  %v2133_v49 = vpop.f32.mrf.mxu3 }
 0x512   : > { %v2139_v39 = vadd.f32 %v2133_v49, %v2072_v8  ;;  %v2739_v42 = vld [vmem:[#allocation2 + $0xc] sm:$0xf] }
 0x513   : > { %v2109_v50 = vpop.f32.mrf.mxu1  ;;  %v2174_v51 = vpop.f32.mrf.mxu0 }
 0x514   : > { %v2204_v5 = vadd.f32 %v2174_v51, %v2137_v63 }
 0x519   : > { %v2135_v52 = vpop.f32.mrf.mxu3  ;;  %v2200_v53 = vpop.f32.mrf.mxu2 }
 0x51a   : > { %v2206_v14 = vadd.f32 %v2200_v53, %v2139_v39  ;;  %v2710_v52 = vld [vmem:[#allocation2] sm:$0xf] }
 0x51b   : > { %v2176_v54 = vpop.f32.mrf.mxu0  ;;  %v2187_v55 = vpop.f32.mrf.mxu1 }
 0x51c   : > { %v2205_v12 = vadd.f32 %v2187_v55, %v2138_v10 }
 0x521   : > { %v2202_v56 = vpop.f32.mrf.mxu2  ;;  %v2241_v57 = vpop.f32.mrf.mxu3 }
 0x522   : > { %v2271_v11 = vadd.f32 %v2241_v57, %v2204_v5 }
 0x523   : > { %v2189_v58 = vpop.f32.mrf.mxu1  ;;  %v2254_v59 = vpop.f32.mrf.mxu0 }
 0x524   : > { %v2272_v15 = vadd.f32 %v2254_v59, %v2205_v12  ;;  %v2384_v59 = vld [vmem:[%s3555_s8] sm:$0x3] }
 0x529   : > { %v2243_v0 = vpop.f32.mrf.mxu3  ;;  %v2308_v1 = vpop.f32.mrf.mxu2 }
 0x52a   : > { %v2338_v13 = vadd.f32 %v2308_v1, %v2271_v11 }
 0x52b   : > { %v2256_v2 = vpop.f32.mrf.mxu0  ;;  %v2267_v7 = vpop.f32.mrf.mxu1 }
 0x52c   : > { %v2341_v18 = vmax.f32 %v2338_v13, 0.0  ;;  %v2273_v19 = vadd.f32 %v2267_v7, %v2206_v14  ;;  %v2871_v7 = vmov 839922192   ;;  %v2370_v13 = vld [vmem:[%s2980_s29] sm:$0xff] }
 0x52d   : > { %v2378_v8 = vunpack.c.l.s4 %v2871_v7 }
 0x52e   : > { %v2344_v26 = vsel %vm3144_vm13, %v2341_v18, 0.0 }
 0x52f   : > { %v2379_v10 = vunpack.c.0.s8 %v2378_v8 }
 0x531   : > { %v2310_v16 = vpop.f32.mrf.mxu2  ;;  %v2321_v17 = vpop.f32.mrf.mxu3 }
 0x532   : > { %v2339_v20 = vadd.f32 %v2321_v17, %v2272_v15  ;;  %v2371_v15 = vld [vmem:[%s2980_s29 + $0x8] sm:$0xff]  ;;  %s2817_s29 = scalar_lea.hbm %s3557_s10, 24 }
 0x533   : > { %v2334_v21 = vpop.f32.mrf.mxu0  ;;  %v2269_v22 = vpop.f32.mrf.mxu1 }
 0x534   : > { %v2342_v24 = vmax.f32 %v2339_v20, 0.0  ;;  %v2340_v25 = vadd.f32 %v2334_v21, %v2273_v19 }
 0x536   : > { %v2345_v27 = vsel %vm3148_vm14, %v2342_v24, 0.0  ;;  %v2343_v28 = vmax.f32 %v2340_v25, 0.0 }
 0x537   : > { %v2347_v29 = vpack.c.bf16 %v2345_v27, %v2344_v26 }
 0x538   : > { %v2346_v30 = vsel %vm3156_vm15, %v2343_v28, 0.0 }
 0x539   : > { %v2348_v32 = vpack.c.bf16 %v2346_v30, %v2346_v30  ;;  %v2323_v33 = vpop.f32.mrf.mxu3  ;;  %v2351_v34 = vrot.slane %v2347_v29, 6 }
 0x53b   : > { %v2352_v35 = vrot.slane %v2348_v32, 6  ;;  %2353 = vrot.lane.b32.xlu1 %v2351_v34, %s2870_s25  ;;  %v2336_v37 = vpop.f32.mrf.mxu0 }
 0x53d   : > { %2355 = vrot.lane.b32.xlu2 %v2352_v35, %s2870_s25 }
 0x597   : > { %v2356_v38 = vpop.permute.xlu2 %2355 }
 0x598   : > { %v2358_v40 = vrot.slane %v2356_v38, 4 }
 0x5ad   : > { %v2354_v6 = vpop.permute.xlu1 %2353 }
 0x5ae   : > { %v2357_v41 = vrot.slane %v2354_v6, 4 }
 0x5b0   : > { %v2359_v9 = vsel %vm1042_vm10, %v2357_v41, %v2354_v6  ;;  %v2360_v43 = vsel %vm1044_vm8, %v2357_v41, %v2358_v40 }
 0x5b1   : > { %v2361_v23 = vsel %vm1042_vm10, %v2360_v43, %v2356_v38  ;;  %2364 = vst.msk [vmem:[#allocation2 + $0x10] sm:$0xcc] %vm3165_vm12, %v2359_v9 }
 0x5b2   : > { %2365 = vst.msk [vmem:[#allocation2 + $0x18] sm:$0xcc] %vm3172_vm7, %v2361_v23  ;;  %vm2415_vm7 = vcmask 130048  }
 0x5b8   : > { %v2712_v45 = vld [vmem:[#allocation2 + $0x10] sm:$0xf0]  ;;  %v2740_v31 = vld [vmem:[#allocation2 + $0xc] sm:$0xf0] }
 0x5b9   : > { %v2715_v47 = vor.u32 %v2738_v44, %v2712_v45  ;;  %v2741_v48 = vld [vmem:[#allocation2 + $0x14] sm:$0xf0]  ;;  %v2720_v49 = vld [vmem:[#allocation2 + $0x18] sm:$0xf0]  ;;  %v2711_v53 = vor.u32 %v2740_v31, %v2710_v52 }
 0x5ba   : > { %v2719_v50 = vor.u32 %v2741_v48, %v2718_v46  ;;  %v2723_v51 = vor.u32 %v2739_v42, %v2720_v49 }
 0x5bb   : > { %2403 = vrot.lane.b32.xlu1 %v2715_v47, %s3597_s20 }
 0x5bc   : > { %2405 = vrot.lane.b32.xlu2 %v2719_v50, %s3597_s20  ;;  %2407 = vrot.lane.b32.xlu0 %v2723_v51, %s3597_s20 }
 0x5c3   : > { %2401 = vrot.lane.b32.xlu1 %v2711_v53, %s3597_s20 }
 0x5c4   : > { %2375 = vperm.xlu2 %2794, %v2372_v36  }
 0x616   : > { %v2406_v54 = vpop.permute.xlu2 %2405 }
 0x61e   : > { %v2376_v11 = vpop.permute.xlu2 %2375 }
 0x61f   : > { %v2380_v39 = vperm.slane %v2376_v11, %v2379_v10 }
 0x621   : > { %v2382_v18 = vadd.f32 %v2380_v39, %v2370_v13  ;;  %v2383_v19 = vadd.f32 %v2380_v39, %v2371_v15 }
 0x62d   : > { %v2404_v55 = vpop.permute.xlu1 %2403 }
 0x62e   : > { %v2410_v56 = vsel %vm687_vm5, %v2404_v55, %v2406_v54  ;;  %v2408_v57 = vpop.permute.xlu0 %2407 }
 0x62f   : > { %v2411_v58 = vsel %vm687_vm5, %v2406_v54, %v2408_v57  ;;  %2439 = vmatpush.bf16.msra.mxu2 %v2410_v56 }
 0x630   : > { %2452 = vmatpush.bf16.msra.mxu3 %v2411_v58 }
 0x632   : > { %2725 = vmatmul.msk.bf16.vlgmr.msra.gmra.mxu2 %vm2415_vm7, %v2384_v59 }
 0x633   : > { %2726 = vmatmul.msk.bf16.vlgmr.msra.gmra.mxu3 %vm2415_vm7, %v2384_v59 }
 0x635   : > { %v2402_v60 = vpop.permute.xlu1 %2401 }
 0x636   : > { %v2409_v61 = vsel %vm687_vm5, %v2402_v60, %v2404_v55 }
 0x637   : > { %2426 = vmatpush.bf16.msra.mxu1 %v2409_v61 }
 0x63a   : > { %2724 = vmatmul.msk.bf16.vlgmr.msra.gmra.mxu1 %vm2415_vm7, %v2384_v59 }
 0x6b5   : > { %v2441_v62 = vpop.f32.mrf.mxu2 }
 0x6b6   : > { %v2461_v63 = vrot.slane %v2441_v62, 4  ;;  %v2454_v0 = vpop.f32.mrf.mxu3 }
 0x6b7   : > { %v2428_v1 = vpop.f32.mrf.mxu1  ;;  %2465 = vrot.lane.b32.xlu1 %v2454_v0, %s2870_s25 }
 0x6b8   : > { %v2462_v3 = vsel %vm1044_vm8, %v2428_v1, %v2461_v63 }
 0x6b9   : > { %2463 = vrot.lane.b32.xlu0 %v2462_v3, %s2870_s25  ;;  %s350_s25 = sand.u32 1, %s2851_s14  }
 0x6ba   : > { %s2742_s12 = smul.u32 12, %s350_s25  ;;  %s2494_s17 = scalar_lea.sflag [#allocation4], %s350_s25 }
 0x6bc   : > { %s352_s11 = scalar_lea.vmem [#allocation3], %s2742_s12 }
 0x6bd   : > { %v2443_v4 = vpop.f32.mrf.mxu2  ;;  %s2507_s26 = sshll.u32 %s352_s11, 4  ;;  %s2508_s26 = int_to_ptr.vmem [resolvable:$true] %s2507_s26 }
 0x6be   : > { %v2456_v5 = vpop.f32.mrf.mxu3 }
 0x6bf   : > { %v2430_v2 = vpop.f32.mrf.mxu1 }
 0x729   : > { %v2466_v12 = vpop.permute.xlu1 %2465 }
 0x72a   : > { %v2468_v14 = vrot.slane %v2466_v12, 4 }
 0x72b   : > { %v2464_v16 = vpop.permute.xlu0 %2463 }
 0x72c   : > { %v2467_v17 = vrot.slane %v2464_v16, 4 }
 0x72e   : > { %v2470_v20 = vsel %vm1042_vm10, %v2467_v17, %v2464_v16  ;;  %v2471_v21 = vsel %vm1044_vm8, %v2467_v17, %v2468_v14 }
 0x72f   : > { %v2475_v22 = vadd.f32 %v2470_v20, %v2382_v18  ;;  %v2472_v24 = vsel %vm1042_vm10, %v2471_v21, %v2466_v12 }
 0x730   : > { %v2476_v25 = vadd.f32 %v2472_v24, %v2383_v19 }
 0x731   : > { %2479 = vrot.lane.b32.xlu2 %v2475_v22, %s3597_s20 }
 0x732   : > { %2481 = vrot.lane.b32.xlu0 %v2476_v25, %s3597_s20  ;;  %s2811_s20 = sshra.s32 %s2510_s27, 4  ;;  %s2812_s20 = int_to_ptr.hbm [resolvable:$true] %s2811_s20 }
 0x733   : > { %s2813_s30 = scalar_lea.hbm %s2812_s20, 12  ;;  %p2818_p0 = scmp.lt.s32.totalorder %s2812_s20, %s3557_s10 }
 0x734   : > { %p2814_p11 = scmp.ne.s32.totalorder %s2812_s20, %s2813_s30  ;;  %p2819_p1 = scmp.lt.s32.totalorder %s2817_s29, %s2813_s30 }
 0x736   : > { %p2815_p12 = pnand %p2814_p11, %p2965_p5  ;;  %p2820_p2 = por %p2819_p1, %p2818_p0 }
 0x738   : > { %p2816_p13 = pneg %p2815_p12 }
 0x73a   : > { %p2821_p3 = pnand %p2820_p2, %p2816_p13 }
 0x78b   : > { %v2480_v26 = vpop.permute.xlu2 %2479 }
 0x78c   : > { %v2483_v28 = vrot.slane %v2480_v26, 4 }
 0x7a4   : > { %v2482_v27 = vpop.permute.xlu0 %2481 }
 0x7a5   : > { %v2484_v29 = vrot.slane %v2482_v27, 4 }
 0x7a7   : > { %v2485_v30 = vsel %vm1044_vm8, %v2483_v28, %v2484_v29  ;;  %v2488_v32 = vsel %vm687_vm5, %v2482_v27, %v2484_v29 }
 0x7a8   : > { %2492 = vst [vmem:[%s352_s11 + $0x8] sm:$0xf] %v2488_v32  ;;  %v2487_v33 = vsel %vm687_vm5, %v2480_v26, %v2485_v30 }
 0x7a9   : > { %2491 = vst [vmem:[%s352_s11] sm:$0xff] %v2487_v33 }
 0x7aa   : > { %2824 = shalt.err (!%p2821_p3)
}
 0x7ab   : > { %2744 = dma.vmem_to_hbm [thread:$0]  (%p2965_p5), %s2508_s26, 192, %s2510_s27, %s2494_s17  }
 0x7ac PF: > { %p2750_p4 = scmp.ge.s32.totalorder %s2859_s16, 2  ;;  %s2521_s25 = sand.u32 1, %s2847_s13  }
 0x7ad   : > { %s2522_s11 = scalar_lea.sflag [#allocation4], %s2521_s25 }
 0x7ae   : > { %p2747_p7 = pnand %p2750_p4, %p2969_p6 }
 0x7b0   : > { %p2748_p8 = pneg %p2747_p7 }
 0x7b2   : > { %2842 = dma.done.wait (%p2748_p8), %s2522_s11, 192  }
 0x7b3   : > { %2844 = vsyncadd (%p2748_p8), %s2522_s11, 4294967104  ;;  %p20_p9 = scmp.ge.s32.totalorder %s2952_s19, 4   ;;  %s3612_s13 = smov %s2851_s14 }
 0x7b4   : > { %s3613_s14 = smov %s2855_s15  ;;  %s3614_s15 = smov %s2963_s22 }
 0x7b5   : > { %s3615_s16 = smov %s2952_s19  ;;  %22 = sbr.rel (!%p20_p9) target bundleno = 3 (0x3), region = 120 }
 0x7ba   :  { %2528 = vsyncpa [#allocation4], 1 }
 0x7bb   :  { %2530 = vsyncpa [#allocation4 + $0x1], 1 }

</bundles_post_ra>
